<compile_context>
chip_gen: v7x
topology: tpu7x:2x2x1
jax: 0.10.0
libtpu: 0.0.40
codegen_flags: <defaults>
</compile_context>

<pallas_src>
import jax
import jax.numpy as jnp
from jax.experimental import pallas as pl
from jax.experimental.pallas import tpu as pltpu

LANE = 128  # TPU lane width; output padded to a multiple of this for dense stores

# Fusion weights from the module __init__ defaults.
EEG_W = 1.0 / 3.0
NIRS_OXY_W = 1.0 / 3.0
NIRS_DEOXY_W = 1.0 / 3.0


def _round_up(x, m):
    return ((x + m - 1) // m) * m


def _multimodal_kernel(
    eeg_ref, oxy_ref, deoxy_ref,        # (TB, F_*) activations, native f32
    w1e_ref, w1o_ref, w1d_ref,          # first-layer weights, VMEM-resident, compute dtype
    b1_ref,                             # (1, 3H) concatenated first-layer bias, f32
    w2_ref,                             # (3H, C_pad) pre-scaled, concatenated, lane-padded
    b2_ref,                             # (1, C_pad) pre-scaled, summed, lane-padded, f32
    out_ref,                            # (TB, C_pad) output slab (compute/out dtype)
    h_ref,                              # (TB, 3H) f32 VMEM scratch (hidden slab)
):
    cdt = w1e_ref.dtype                 # MXU operand dtype (bf16 or f32)
    hdim = w1e_ref.shape[1]             # hidden width per modality

    # First layers: one MXU matmul per modality, f32 accumulation.  Activations
    # are cast from f32 to the operand dtype here (no wrapper-side HBM pass),
    # and results land directly in lane-aligned slices of the hidden slab
    # (no jnp.concatenate / extra VMEM round-trip).
    h_ref[:, 0:hdim] = jnp.dot(
        eeg_ref[...].astype(cdt), w1e_ref[...], preferred_element_type=jnp.float32)
    h_ref[:, hdim:2 * hdim] = jnp.dot(
        oxy_ref[...].astype(cdt), w1o_ref[...], preferred_element_type=jnp.float32)
    h_ref[:, 2 * hdim:3 * hdim] = jnp.dot(
        deoxy_ref[...].astype(cdt), w1d_ref[...], preferred_element_type=jnp.float32)

    # One fused bias-add + ReLU pass over the (TB, 3H) slab.
    hid = jnp.maximum(h_ref[...] + b1_ref[...], 0.0)

    # Second layers + weighted fusion folded into a single K=3H matmul:
    #   W2_cat = concat([w_eeg*W2e, w_oxy*W2o, w_deoxy*W2d], axis=0), lane-padded.
    out = jnp.dot(hid.astype(w2_ref.dtype), w2_ref[...],
                  preferred_element_type=jnp.float32) + b2_ref[...]
    out_ref[...] = out.astype(out_ref.dtype)


def prepare_params(params, eeg_w=EEG_W, nirs_oxy_w=NIRS_OXY_W,
                   nirs_deoxy_w=NIRS_DEOXY_W, *, compute_dtype=jnp.bfloat16):
    """One-time parameter preparation (hoisted out of the per-call hot path).

    Folds the fusion weights into the second layer, concatenates the three
    heads along K, lane-pads the class dim to a multiple of 128, and casts the
    weights to the MXU operand dtype.  `params` is a dict of per-modality
    (w1, b1, w2, b2) tuples in f32.
    """
    w1e, b1e, w2e, b2e = params["eeg"]
    w1o, b1o, w2o, b2o = params["oxy"]
    w1d, b1d, w2d, b2d = params["deoxy"]
    num_classes = w2e.shape[-1]
    c_pad = _round_up(num_classes, LANE)

    w2_cat = jnp.concatenate(
        [eeg_w * w2e, nirs_oxy_w * w2o, nirs_deoxy_w * w2d], axis=0)
    b2_cat = eeg_w * b2e + nirs_oxy_w * b2o + nirs_deoxy_w * b2d
    w2_cat = jnp.pad(w2_cat, ((0, 0), (0, c_pad - num_classes)))
    b2_cat = jnp.pad(b2_cat, ((0, 0), (0, c_pad - num_classes)))
    b1_cat = jnp.concatenate([b1e, b1o, b1d], axis=-1)

    return {
        "w1_eeg": w1e.astype(compute_dtype),
        "w1_oxy": w1o.astype(compute_dtype),
        "w1_deoxy": w1d.astype(compute_dtype),
        "b1": b1_cat.astype(jnp.float32),
        "w2": w2_cat.astype(compute_dtype),
        "b2": b2_cat.astype(jnp.float32),
        "num_classes": num_classes,      # static python int
    }


def multimodal_classifier(eeg, nirs_oxy, nirs_deoxy, fused, *,
                          batch_tile=1024, out_dtype=None):
    """Hot path: a single pallas_call over batch tiles.

    `fused` is the output of prepare_params().  Activations stay in their
    native f32; the kernel casts to the MXU operand dtype after the DMA.
    """
    B, f_eeg = eeg.shape
    f_oxy = nirs_oxy.shape[1]
    f_deoxy = nirs_deoxy.shape[1]

    w1e, w1o, w1d = fused["w1_eeg"], fused["w1_oxy"], fused["w1_deoxy"]
    b1, w2, b2 = fused["b1"], fused["w2"], fused["b2"]
    num_classes = fused["num_classes"]
    hidden = w1e.shape[1]
    c_pad = w2.shape[1]
    if out_dtype is None:
        out_dtype = w1e.dtype            # bf16 slab on the bf16 path, f32 on the exact path

    # Batch tiling: 16-row granule (bf16 sublane pairs), aim for >= 2 tiles so
    # v7x's two TensorCores both get work, cap at batch_tile rows per tile.
    # The cdiv grid handles a partial last tile: its out-of-bounds rows read
    # stale VMEM and are never written back (rows are independent -- do NOT
    # add any cross-row reduction to this kernel without reinstating masking).
    if B <= 16:
        tb = _round_up(B, 8)
    else:
        tb = min(batch_tile, _round_up(pl.cdiv(B, 2), 16))
    grid = (pl.cdiv(B, tb),)

    def resident(x):
        # Same block index every grid step -> stays VMEM-resident across the grid.
        return pl.BlockSpec(x.shape, lambda i: (0, 0))

    out = pl.pallas_call(
        _multimodal_kernel,
        out_shape=jax.ShapeDtypeStruct((B, c_pad), out_dtype),
        grid=grid,
        in_specs=[
            pl.BlockSpec((tb, f_eeg), lambda i: (i, 0)),
            pl.BlockSpec((tb, f_oxy), lambda i: (i, 0)),
            pl.BlockSpec((tb, f_deoxy), lambda i: (i, 0)),
            resident(w1e), resident(w1o), resident(w1d),
            resident(b1), resident(w2), resident(b2),
        ],
        out_specs=pl.BlockSpec((tb, c_pad), lambda i: (i, 0)),
        scratch_shapes=[pltpu.VMEM((tb, 3 * hidden), jnp.float32)],
        compiler_params=pltpu.CompilerParams(
            dimension_semantics=("parallel",),   # v7x: 2 TCs split the batch tiles
            vmem_limit_bytes=32 * 1024 * 1024,   # safe on v5e/v6e/v7x for these tiles
        ),
    )(eeg, nirs_oxy, nirs_deoxy, w1e, w1o, w1d, b1, w2, b2)

    # Slice off the lane padding; upcast only the tiny (B, C) result.
    return out[:, :num_classes].astype(jnp.float32)


# ----------------------------------------------------------------------------
# Demo / correctness check
# ----------------------------------------------------------------------------

def _init_mlp_params(key, in_features, hidden, num_classes):
    k1, k2, k3, k4 = jax.random.split(key, 4)
    w1 = jax.random.normal(k1, (in_features, hidden), jnp.float32) / jnp.sqrt(in_features)
    b1 = 0.01 * jax.random.normal(k2, (1, hidden), jnp.float32)
    w2 = jax.random.normal(k3, (hidden, num_classes), jnp.float32) / jnp.sqrt(hidden)
    b2 = 0.01 * jax.random.normal(k4, (1, num_classes), jnp.float32)
    return (w1, b1, w2, b2)


def _reference(eeg, oxy, deoxy, params):
    # Mirrors the PyTorch module forward exactly (f32 throughout).
    def mlp(x, p):
        w1, b1, w2, b2 = p
        return jnp.maximum(x @ w1 + b1, 0.0) @ w2 + b2
    return (EEG_W * mlp(eeg, params["eeg"])
            + NIRS_OXY_W * mlp(oxy, params["oxy"])
            + NIRS_DEOXY_W * mlp(deoxy, params["deoxy"]))


if __name__ == "__main__":
    key = jax.random.PRNGKey(0)

    B = 150          # not a tile multiple: exercises the cdiv-grid partial tile
    F_EEG = 256      # flattened EEG features
    F_NIRS = 128     # flattened NIRS features (oxy / deoxy)
    HIDDEN = 128
    NUM_CLASSES = 4

    k_eeg, k_oxy, k_deoxy, k_pe, k_po, k_pd = jax.random.split(key, 6)

    eeg = jax.random.normal(k_eeg, (B, F_EEG), jnp.float32)
    nirs_oxy = jax.random.normal(k_oxy, (B, F_NIRS), jnp.float32)
    nirs_deoxy = jax.random.normal(k_deoxy, (B, F_NIRS), jnp.float32)

    params = {
        "eeg": _init_mlp_params(k_pe, F_EEG, HIDDEN, NUM_CLASSES),
        "oxy": _init_mlp_params(k_po, F_NIRS, HIDDEN, NUM_CLASSES),
        "deoxy": _init_mlp_params(k_pd, F_NIRS, HIDDEN, NUM_CLASSES),
    }

    ref = _reference(eeg, nirs_oxy, nirs_deoxy, params)

    # Exact-precision path (f32 operands, f32 output slab): tight semantics check.
    fused_f32 = prepare_params(params, compute_dtype=jnp.float32)
    out_f32 = multimodal_classifier(eeg, nirs_oxy, nirs_deoxy, fused_f32)
    out_f32 = jax.block_until_ready(out_f32)
    assert out_f32.shape == (B, NUM_CLASSES)
    assert jnp.allclose(out_f32, ref, atol=1e-4, rtol=1e-4)

    # bf16 operands / f32 accumulation / bf16 output slab: the bandwidth-optimal path.
    fused_bf16 = prepare_params(params, compute_dtype=jnp.bfloat16)
    out_bf16 = multimodal_classifier(eeg, nirs_oxy, nirs_deoxy, fused_bf16)
    out_bf16 = jax.block_until_ready(out_bf16)
    assert out_bf16.shape == (B, NUM_CLASSES)
    assert jnp.allclose(out_bf16, ref, atol=5e-2, rtol=5e-2)

    print("KERNEL_OK")
</pallas_src>

<mosaic_0001>
module attributes {stable_mosaic.version = 11 : i64} {
  func.func @_multimodal_kernel(%arg0: i32, %arg1: memref<80x256xf32, #tpu.memory_space<vmem>>, %arg2: memref<80x128xf32, #tpu.memory_space<vmem>>, %arg3: memref<80x128xf32, #tpu.memory_space<vmem>>, %arg4: memref<256x128xf32, #tpu.memory_space<vmem>>, %arg5: memref<128x128xf32, #tpu.memory_space<vmem>>, %arg6: memref<128x128xf32, #tpu.memory_space<vmem>>, %arg7: memref<1x384xf32, #tpu.memory_space<vmem>>, %arg8: memref<384x128xf32, #tpu.memory_space<vmem>>, %arg9: memref<1x128xf32, #tpu.memory_space<vmem>>, %arg10: memref<80x128xf32, #tpu.memory_space<vmem>>, %arg11: memref<80x384xf32, #tpu.memory_space<vmem>>) attributes {dimension_semantics = [#tpu.dimension_semantics<parallel>], iteration_bounds = array<i64: 2>, scalar_prefetch = 0 : i64, scratch_operands = 1 : i64, tpu.core_type = #tpu.core_type<tc>, window_params = [{transform_indices = @transform_0, window_bounds = array<i64: 80, 256>}, {transform_indices = @transform_1, window_bounds = array<i64: 80, 128>}, {transform_indices = @transform_2, window_bounds = array<i64: 80, 128>}, {pipeline_mode = #tpu.pipeline_mode<synchronous>, transform_indices = @transform_3, window_bounds = array<i64: 256, 128>}, {pipeline_mode = #tpu.pipeline_mode<synchronous>, transform_indices = @transform_4, window_bounds = array<i64: 128, 128>}, {pipeline_mode = #tpu.pipeline_mode<synchronous>, transform_indices = @transform_5, window_bounds = array<i64: 128, 128>}, {pipeline_mode = #tpu.pipeline_mode<synchronous>, transform_indices = @transform_6, window_bounds = array<i64: 1, 384>}, {pipeline_mode = #tpu.pipeline_mode<synchronous>, transform_indices = @transform_7, window_bounds = array<i64: 384, 128>}, {pipeline_mode = #tpu.pipeline_mode<synchronous>, transform_indices = @transform_8, window_bounds = array<i64: 1, 128>}, {transform_indices = @transform_9, window_bounds = array<i64: 80, 128>}]} {
    %c0 = arith.constant 0 : index
    %c0_0 = arith.constant 0 : index
    %0 = vector.load %arg1[%c0, %c0_0] : memref<80x256xf32, #tpu.memory_space<vmem>>, vector<80x256xf32>
    %c0_1 = arith.constant 0 : index
    %c0_2 = arith.constant 0 : index
    %1 = vector.load %arg4[%c0_1, %c0_2] : memref<256x128xf32, #tpu.memory_space<vmem>>, vector<256x128xf32>
    %cst = arith.constant dense<0.000000e+00> : vector<80x128xf32>
    %2 = tpu.matmul %0, %1, %cst {dimension_numbers = #tpu.dot_dimension_numbers<[1], [0], [0], [1], [0, 0, 1, 1], [], []>} : vector<80x256xf32>, vector<256x128xf32>, vector<80x128xf32> -> vector<80x128xf32>
    %c0_3 = arith.constant 0 : index
    %c0_4 = arith.constant 0 : index
    %3 = vector.load %arg11[%c0_3, %c0_4] : memref<80x384xf32, #tpu.memory_space<vmem>>, vector<80x128xf32>
    tpu.vector_store %arg11[%c0_3, %c0_4], %2 {strides = array<i32>} : memref<80x384xf32, #tpu.memory_space<vmem>>, vector<80x128xf32>,
    %c0_5 = arith.constant 0 : index
    %c0_6 = arith.constant 0 : index
    %4 = vector.load %arg2[%c0_5, %c0_6] : memref<80x128xf32, #tpu.memory_space<vmem>>, vector<80x128xf32>
    %c0_7 = arith.constant 0 : index
    %c0_8 = arith.constant 0 : index
    %5 = vector.load %arg5[%c0_7, %c0_8] : memref<128x128xf32, #tpu.memory_space<vmem>>, vector<128x128xf32>
    %cst_9 = arith.constant dense<0.000000e+00> : vector<80x128xf32>
    %6 = tpu.matmul %4, %5, %cst_9 {dimension_numbers = #tpu.dot_dimension_numbers<[1], [0], [0], [1], [0, 0, 1, 1], [], []>} : vector<80x128xf32>, vector<128x128xf32>, vector<80x128xf32> -> vector<80x128xf32>
    %c0_10 = arith.constant 0 : index
    %c128 = arith.constant 128 : index
    %7 = vector.load %arg11[%c0_10, %c128] : memref<80x384xf32, #tpu.memory_space<vmem>>, vector<80x128xf32>
    tpu.vector_store %arg11[%c0_10, %c128], %6 {strides = array<i32>} : memref<80x384xf32, #tpu.memory_space<vmem>>, vector<80x128xf32>,
    %c0_11 = arith.constant 0 : index
    %c0_12 = arith.constant 0 : index
    %8 = vector.load %arg3[%c0_11, %c0_12] : memref<80x128xf32, #tpu.memory_space<vmem>>, vector<80x128xf32>
    %c0_13 = arith.constant 0 : index
    %c0_14 = arith.constant 0 : index
    %9 = vector.load %arg6[%c0_13, %c0_14] : memref<128x128xf32, #tpu.memory_space<vmem>>, vector<128x128xf32>
    %cst_15 = arith.constant dense<0.000000e+00> : vector<80x128xf32>
    %10 = tpu.matmul %8, %9, %cst_15 {dimension_numbers = #tpu.dot_dimension_numbers<[1], [0], [0], [1], [0, 0, 1, 1], [], []>} : vector<80x128xf32>, vector<128x128xf32>, vector<80x128xf32> -> vector<80x128xf32>
    %c0_16 = arith.constant 0 : index
    %c256 = arith.constant 256 : index
    %11 = vector.load %arg11[%c0_16, %c256] : memref<80x384xf32, #tpu.memory_space<vmem>>, vector<80x128xf32>
    tpu.vector_store %arg11[%c0_16, %c256], %10 {strides = array<i32>} : memref<80x384xf32, #tpu.memory_space<vmem>>, vector<80x128xf32>,
    %c0_17 = arith.constant 0 : index
    %c0_18 = arith.constant 0 : index
    %12 = vector.load %arg11[%c0_17, %c0_18] : memref<80x384xf32, #tpu.memory_space<vmem>>, vector<80x384xf32>
    %c0_19 = arith.constant 0 : index
    %c0_20 = arith.constant 0 : index
    %13 = vector.load %arg7[%c0_19, %c0_20] : memref<1x384xf32, #tpu.memory_space<vmem>>, vector<1x384xf32>
    %14 = vector.broadcast %13 : vector<1x384xf32> to vector<80x384xf32>
    %15 = arith.addf %12, %14 : vector<80x384xf32>
    %cst_21 = arith.constant 0.000000e+00 : f32
    %16 = vector.broadcast %cst_21 : f32 to vector<80x384xf32>
    %17 = arith.maximumf %15, %16 : vector<80x384xf32>
    %c0_22 = arith.constant 0 : index
    %c0_23 = arith.constant 0 : index
    %18 = vector.load %arg8[%c0_22, %c0_23] : memref<384x128xf32, #tpu.memory_space<vmem>>, vector<384x128xf32>
    %cst_24 = arith.constant dense<0.000000e+00> : vector<80x128xf32>
    %19 = tpu.matmul %17, %18, %cst_24 {dimension_numbers = #tpu.dot_dimension_numbers<[1], [0], [0], [1], [0, 0, 1, 1], [], []>} : vector<80x384xf32>, vector<384x128xf32>, vector<80x128xf32> -> vector<80x128xf32>
    %c0_25 = arith.constant 0 : index
    %c0_26 = arith.constant 0 : index
    %20 = vector.load %arg9[%c0_25, %c0_26] : memref<1x128xf32, #tpu.memory_space<vmem>>, vector<1x128xf32>
    %21 = vector.broadcast %20 : vector<1x128xf32> to vector<80x128xf32>
    %22 = arith.addf %19, %21 : vector<80x128xf32>
    %c0_27 = arith.constant 0 : index
    %c0_28 = arith.constant 0 : index
    %23 = vector.load %arg10[%c0_27, %c0_28] : memref<80x128xf32, #tpu.memory_space<vmem>>, vector<80x128xf32>
    tpu.vector_store %arg10[%c0_27, %c0_28], %22 {strides = array<i32>} : memref<80x128xf32, #tpu.memory_space<vmem>>, vector<80x128xf32>,
    return
  }
  func.func @transform_0(%arg0: i32) -> (i32, i32) {
    %c0_i32 = arith.constant 0 : i32
    %c0_i32_0 = arith.constant 0 : i32
    return %arg0, %c0_i32 : i32, i32
  }
  func.func @transform_1(%arg0: i32) -> (i32, i32) {
    %c0_i32 = arith.constant 0 : i32
    %c0_i32_0 = arith.constant 0 : i32
    return %arg0, %c0_i32 : i32, i32
  }
  func.func @transform_2(%arg0: i32) -> (i32, i32) {
    %c0_i32 = arith.constant 0 : i32
    %c0_i32_0 = arith.constant 0 : i32
    return %arg0, %c0_i32 : i32, i32
  }
  func.func @transform_3(%arg0: i32) -> (i32, i32) {
    %c0_i32 = arith.constant 0 : i32
    %c0_i32_0 = arith.constant 0 : i32
    %c0_i32_1 = arith.constant 0 : i32
    return %c0_i32, %c0_i32_0 : i32, i32
  }
  func.func @transform_4(%arg0: i32) -> (i32, i32) {
    %c0_i32 = arith.constant 0 : i32
    %c0_i32_0 = arith.constant 0 : i32
    %c0_i32_1 = arith.constant 0 : i32
    return %c0_i32, %c0_i32_0 : i32, i32
  }
  func.func @transform_5(%arg0: i32) -> (i32, i32) {
    %c0_i32 = arith.constant 0 : i32
    %c0_i32_0 = arith.constant 0 : i32
    %c0_i32_1 = arith.constant 0 : i32
    return %c0_i32, %c0_i32_0 : i32, i32
  }
  func.func @transform_6(%arg0: i32) -> (i32, i32) {
    %c0_i32 = arith.constant 0 : i32
    %c0_i32_0 = arith.constant 0 : i32
    %c0_i32_1 = arith.constant 0 : i32
    return %c0_i32, %c0_i32_0 : i32, i32
  }
  func.func @transform_7(%arg0: i32) -> (i32, i32) {
    %c0_i32 = arith.constant 0 : i32
    %c0_i32_0 = arith.constant 0 : i32
    %c0_i32_1 = arith.constant 0 : i32
    return %c0_i32, %c0_i32_0 : i32, i32
  }
  func.func @transform_8(%arg0: i32) -> (i32, i32) {
    %c0_i32 = arith.constant 0 : i32
    %c0_i32_0 = arith.constant 0 : i32
    %c0_i32_1 = arith.constant 0 : i32
    return %c0_i32, %c0_i32_0 : i32, i32
  }
  func.func @transform_9(%arg0: i32) -> (i32, i32) {
    %c0_i32 = arith.constant 0 : i32
    %c0_i32_0 = arith.constant 0 : i32
    return %arg0, %c0_i32 : i32, i32
  }
}

</mosaic_0001>

<bundles_post_ra>
// kernel: tpu_custom_call.1
= control target key start
LH: loop header
LB: loop body
LE: loop exit
PB: predicated region body
PF: predicated region fallthrough
CT: control target
= control target key end

     0   :  { %s3067_s0 = inlined_call_operand.hbm [shape: f32[150,256], index: 0, kind: input, shape index: {}]   ;;  %s3068_s1 = inlined_call_operand.hbm [shape: f32[150,128], index: 1, kind: input, shape index: {}]   ;;  %s3069_s2 = inlined_call_operand.hbm [shape: f32[150,128], index: 2, kind: input, shape index: {}]   ;;  %s3070_s3 = inlined_call_operand.hbm [shape: f32[256,128], index: 3, kind: input, shape index: {}]   ;;  %s3071_s4 = inlined_call_operand.hbm [shape: f32[128,128], index: 4, kind: input, shape index: {}]   ;;  %s3072_s5 = inlined_call_operand.hbm [shape: f32[128,128], index: 5, kind: input, shape index: {}]   ;;  %s3073_s6 = inlined_call_operand.vmem [shape: f32[1,384], index: 6, kind: input, shape index: {}]   ;;  %s3074_s7 = inlined_call_operand.hbm [shape: f32[384,128], index: 7, kind: input, shape index: {}]   ;;  %s3075_s8 = inlined_call_operand.vmem [shape: f32[1,128], index: 8, kind: input, shape index: {}]   ;;  %s3076_s9 = inlined_call_operand.hbm [shape: f32[150,128], index: 9, kind: output, shape index: {}]  }
   0x1   :  { %3086 = sst [smem:[#allocation26_spill]] %s3070_s3 }
   0x2   :  { %3087 = sst [smem:[#allocation27_spill]] %s3075_s8 }
   0x3   :  { %3088 = sst [smem:[#allocation28_spill]] %s3076_s9 }
   0x4   :  { %14 = vsyncpa [#allocation4], 0 }
   0x5   :  { %16 = vsyncpa [#allocation4 + $0x1], 0 }
   0x6   :  { %17 = vsyncpa [#allocation7], 0 }
   0x7   :  { %19 = vsyncpa [#allocation7 + $0x1], 0 }
   0x8   :  { %20 = vsyncpa [#allocation10], 0 }
   0x9   :  { %21 = vsyncpa [#allocation13], 0 }
   0xa   :  { %22 = vsyncpa [#allocation5], 0 }
   0xb   :  { %24 = vsyncpa [#allocation5 + $0x1], 0  ;;  %s2570_s30 = smov 0   ;;  %s2572_s10 = smov 0  }
   0xc   :  { %s2574_s11 = smov 0   ;;  %s2576_s12 = smov 0  }
   0xd LB: > { %3089 = sst [smem:[#allocation21_spill]] %s2488_s30  ;;  %s2591_s13 = sadd.s32 4294967295, %s2500_s12   ;;  %s2500_s12 = sphi %s2576_s12, %s3118_s12   ;;  %s2496_s11 = sphi %s2574_s11, %s3122_s11   ;;  %s2492_s10 = sphi %s2572_s10, %s3121_s10   ;;  %s2488_s30 = sphi %s2570_s30, %s3120_s30  }
   0xe   : > { %s1582_s14 = sadd.s32 4294967294, %s2500_s12   ;;  %s2595_s15 = sadd.s32 1, %s2500_s12  }
   0xf   : > { %3090 = sst [smem:[#allocation22_spill]] %s2595_s15  ;;  %s37_s16 = sadd.s32 1, %s2496_s11 }
  0x10   : > { %s34_s17 = ssub.s32 %s2500_s12, %s2595_s15  ;;  %p44_p0 = scmp.ne.s32.totalorder %s2496_s11, %s2492_s10 }
  0x11   : > { %p35_p1 = scmp.eq.s32.totalorder %s34_s17, 0  ;;  %p45_p2 = scmp.eq.s32.totalorder %s2500_s12, 0 }
  0x12   : > { %p50_p3 = scmp.ne.s32.totalorder %s2492_s10, %s2488_s30  ;;  %p3079_p4 = scmp.eq.s32.totalorder %s2591_s13, 0 }
  0x13   : > { %s2607_s18 = scalar_select %p35_p1, %s2496_s11, %s37_s16  }
  0x14   : > { %p2609_p5 = por %p45_p2, %p44_p0  ;;  %p2615_p6 = por %p3079_p4, %p50_p3 }
  0x15   : > { %3091 = sst [smem:[#allocation23_spill]] %s2607_s18  ;;  %p252_p7 = scmp.eq.s32.totalorder %s2591_s13, 1 }
  0x16   : > { %s3092_s19 = scalar_select %p2609_p5, 1, 0 }
  0x17   : > { %s3093_s20 = scalar_select %p2615_p6, 1, 0 }
  0x18   : > { %p258_p8 = scmp.eq.s32.totalorder %s1582_s14, 1  ;;  %p1583_p9 = scmp.ge.s32.totalorder %s2500_s12, 1 }
  0x19   : > { %p265_p10 = scmp.lt.s32.totalorder %s2500_s12, 3  ;;  %p2622_p11 = por %p252_p7, %p44_p0 }
  0x1a   : > { %p2626_p12 = por %p258_p8, %p50_p3  ;;  %s2502_s24 = smov [#allocation9]  }
  0x1b   : > { %s3094_s21 = scalar_select %p2622_p11, 1, 0 }
  0x1c   : > { %s3096_s22 = scalar_select %p2626_p12, 1, 0 }
  0x1d   : > { %3095 = sst [smem:[#allocation24_spill]] %s3094_s21  ;;  %p2630_p13 = pnand %p1583_p9, %p265_p10 }
  0x1e   : > { %3097 = sst [smem:[#allocation25_spill]] %s3096_s22  ;;  %s277_s25 = sshll.u32 %s2502_s24, 4  ;;  %s278_s25 = int_to_ptr.vmem [resolvable:$true] %s277_s25 }
  0x1f   : > { %s3098_s23 = scalar_select %p2630_p13, 1, 0 }
  0x20   : > { %p2154_p1 = pneg %p2630_p13  ;;  %s2503_s27 = smov [#allocation12]  }
  0x21   : > { %s303_s28 = sshll.u32 %s2503_s27, 4  ;;  %s3100_s3 = sld [smem:[#allocation26_spill]]  ;;  %s2642_s28 = int_to_ptr.vmem [resolvable:$true] %s303_s28 }
  0x22   : > { %p2638_p2 = pnand %p2154_p1, %p3079_p4 }
  0x24   : > { %p2652_p3 = pneg %p2638_p2 }
  0x27   : > { %s2226_s16 = scalar_lea.hbm %s3100_s3, 4096 }
  0x28   : > { %p2227_p0 = scmp.ne.s32.totalorder %s3100_s3, %s2226_s16  ;;  %p2233_p9 = scmp.lt.u32.totalorder %s2226_s16, %s3100_s3 }
  0x2a   : > { %p2229_p7 = pnand %p2652_p3, %p2227_p0 }
  0x2c   : > { %p2230_p8 = pneg %p2229_p7 }
  0x2e   : > { %p2235_p10 = pnand %p2233_p9, %p2230_p8 }
  0x30   : > { %2238 = shalt.err (!%p2235_p10)
}
  0x31   : > { %s2239_s29 = scalar_lea.vmem %s278_s25, 4096  ;;  %p2247_p11 = scmp.lt.s32.totalorder %s278_s25, %s278_s25 }
  0x32   : > { %p2240_p1 = scmp.ne.s32.totalorder %s278_s25, %s2239_s29  ;;  %p2248_p6 = scmp.lt.s32.totalorder %s2239_s29, %s2239_s29 }
  0x34   : > { %p2242_p4 = pnand %p2240_p1, %p2652_p3  ;;  %p2249_p13 = por %p2248_p6, %p2247_p11 }
  0x36   : > { %p2243_p12 = pneg %p2242_p4 }
  0x38   : > { %p2250_p5 = pnand %p2249_p13, %p2243_p12 }
  0x3a   : > { %2253 = shalt.err (!%p2250_p5)
}
  0x3b   : > { %s2504_s18 = smov 128   ;;  %s2505_s14 = smov 8  }
  0x3c   : > { %2157 = dma.hbm_to_vmem [thread:$0]  (!%p2638_p2), %s3100_s3, 4096, %s278_s25, [#allocation10], %s2504_s18, %s2504_s18, %s2505_s14  }
  0x3d   : > { %s2254_s22 = scalar_lea.hbm %s3072_s5, 2048 }
  0x3e   : > { %p2255_p4 = scmp.ne.s32.totalorder %s3072_s5, %s2254_s22  ;;  %p2261_p11 = scmp.lt.u32.totalorder %s2254_s22, %s3072_s5 }
  0x40   : > { %p2257_p5 = pnand %p2255_p4, %p2652_p3 }
  0x42   : > { %p2258_p6 = pneg %p2257_p5 }
  0x44   : > { %p2263_p12 = pnand %p2261_p11, %p2258_p6 }
  0x46   : > { %2266 = shalt.err (!%p2263_p12)
}
  0x47   : > { %s2267_s25 = scalar_lea.vmem %s2642_s28, 2048  ;;  %p2275_p8 = scmp.lt.s32.totalorder %s2642_s28, %s2642_s28 }
  0x48   : > { %p2268_p13 = scmp.ne.s32.totalorder %s2642_s28, %s2267_s25  ;;  %p2276_p9 = scmp.lt.s32.totalorder %s2267_s25, %s2267_s25 }
  0x4a   : > { %p2270_p0 = pnand %p2268_p13, %p2652_p3  ;;  %p2277_p10 = por %p2276_p9, %p2275_p8 }
  0x4c   : > { %p2271_p7 = pneg %p2270_p0 }
  0x4e   : > { %p2278_p1 = pnand %p2277_p10, %p2271_p7 }
  0x50   : > { %2281 = shalt.err (!%p2278_p1)
}
  0x51   : > { %2163 = dma.hbm_to_vmem [thread:$0]  (!%p2638_p2), %s3072_s5, 2048, %s2642_s28, [#allocation13], %s2504_s18, %s2504_s18, %s2505_s14  }
  0x52   : > { %s2506_s21 = smov [#allocation11]   ;;  %s2507_s15 = smov [#allocation14]  }
  0x53   : > { %s290_s22 = sshll.u32 %s2506_s21, 4  ;;  %s319_s16 = sshll.u32 %s2507_s15, 4  ;;  %s291_s22 = int_to_ptr.vmem [resolvable:$true] %s290_s22  ;;  %s320_s16 = int_to_ptr.vmem [resolvable:$true] %s319_s16 }
  0x54   : > { %s2282_s29 = scalar_lea.hbm %s3071_s4, 2048 }
  0x55   : > { %p2283_p4 = scmp.ne.s32.totalorder %s3071_s4, %s2282_s29  ;;  %p2289_p11 = scmp.lt.u32.totalorder %s2282_s29, %s3071_s4 }
  0x57   : > { %p2285_p5 = pnand %p2283_p4, %p2652_p3 }
  0x59   : > { %p2286_p6 = pneg %p2285_p5 }
  0x5b   : > { %p2291_p12 = pnand %p2289_p11, %p2286_p6 }
  0x5d   : > { %2294 = shalt.err (!%p2291_p12)
}
  0x5e   : > { %s2295_s28 = scalar_lea.vmem %s291_s22, 2048  ;;  %p2303_p8 = scmp.lt.s32.totalorder %s291_s22, %s291_s22 }
  0x5f   : > { %p2296_p13 = scmp.ne.s32.totalorder %s291_s22, %s2295_s28  ;;  %p2304_p9 = scmp.lt.s32.totalorder %s2295_s28, %s2295_s28 }
  0x61   : > { %p2298_p0 = pnand %p2296_p13, %p2652_p3  ;;  %p2305_p10 = por %p2304_p9, %p2303_p8 }
  0x63   : > { %p2299_p7 = pneg %p2298_p0 }
  0x65   : > { %p2306_p1 = pnand %p2305_p10, %p2299_p7 }
  0x67   : > { %2309 = shalt.err (!%p2306_p1)
}
  0x68   : > { %2160 = dma.hbm_to_vmem [thread:$0]  (!%p2638_p2), %s3071_s4, 2048, %s291_s22, [#allocation10], %s2504_s18, %s2504_s18, %s2505_s14  }
  0x69   : > { %s2310_s15 = scalar_lea.hbm %s3074_s7, 6144 }
  0x6a   : > { %p2311_p4 = scmp.ne.s32.totalorder %s3074_s7, %s2310_s15  ;;  %p2317_p11 = scmp.lt.u32.totalorder %s2310_s15, %s3074_s7 }
  0x6c   : > { %p2313_p5 = pnand %p2311_p4, %p2652_p3 }
  0x6e   : > { %p2314_p6 = pneg %p2313_p5 }
  0x70   : > { %p2319_p12 = pnand %p2317_p11, %p2314_p6 }
  0x72   : > { %2322 = shalt.err (!%p2319_p12)
}
  0x73   : > { %s2323_s9 = scalar_lea.vmem %s320_s16, 6144  ;;  %p2331_p8 = scmp.lt.s32.totalorder %s320_s16, %s320_s16 }
  0x74   : > { %p2324_p13 = scmp.ne.s32.totalorder %s320_s16, %s2323_s9  ;;  %p2332_p9 = scmp.lt.s32.totalorder %s2323_s9, %s2323_s9 }
  0x76   : > { %p2326_p0 = pnand %p2324_p13, %p2652_p3  ;;  %p2333_p10 = por %p2332_p9, %p2331_p8 }
  0x78   : > { %p2327_p7 = pneg %p2326_p0 }
  0x7a   : > { %p2334_p1 = pnand %p2333_p10, %p2327_p7 }
  0x7c   : > { %2337 = shalt.err (!%p2334_p1)
}
  0x7d   : > { %2166 = dma.hbm_to_vmem [thread:$0]  (!%p2638_p2), %s3074_s7, 6144, %s320_s16, [#allocation13], %s2504_s18, %s2504_s18, %s2505_s14  }
  0x7e   : > { %p1588_p4 = scmp.ge.s32.totalorder %s2500_s12, 2 }
  0x7f   : > { %p3102_p3 = scmp.ne.s32.totalorder (!%p1588_p4), %s3092_s19, 0 }
  0x80   : > { %332 = sbr.rel (%p1588_p4) target bundleno = 244 (0xf4), region = 40 }
  0x87   : > { %335 = sbr.rel (!%p3102_p3) target bundleno = 170 (0xaa), region = 44  ;;  %s336_s24 = sand.u32 (%p3102_p3), 1, %s2496_s11  }
  0x88   : > { %s341_s3 = smul.u32 (%p3102_p3), 10, %s2500_s12  ;;  %s2749_s14 = scalar_lea.sflag (%p3102_p3), [#allocation4], %s336_s24 }
  0x89   : > { %s2129_s26 = smul.u32 (%p3102_p3), 160, %s336_s24 }
  0x8a   : > { %s342_s8 = ssub.s32 (%p3102_p3), 19, %s341_s3 }
  0x8b   : > { %p343_p5 = scmp.lt.s32.totalorder (%p3102_p3), %s342_s8, 10  ;;  %s340_s16 = scalar_lea.vmem (%p3102_p3), [#allocation3], %s2129_s26 }
  0x8e   : > { %s3124_s8 = smov (!%p343_p5, %s342_s8), 10 }
  0x8f   : > { %s2746_s30 = sshll.u32 %s3124_s8, 8 }
  0x90   : > { %s348_s18 = ssub.s32 2560, %s2746_s30 }
  0x91   : > { %349 = vsyncadd %s2749_s14, %s348_s18  ;;  %p1591_p2 = scmp.ne.s32.totalorder %s2746_s30, 0  ;;  %s1625_s21 = smul.u32 2560, %s2500_s12 }
  0x92   : > { %s355_s15 = sshll.u32 %s340_s16, 4  ;;  %s2342_s28 = scalar_lea.hbm %s3067_s0, 4864  ;;  %s2759_s15 = int_to_ptr.vmem [resolvable:$true] %s355_s15 }
  0x93   : > { %s2757_s29 = scalar_lea.hbm %s3067_s0, %s1625_s21 }
  0x94   : > { %s2338_s25 = scalar_lea.hbm %s2757_s29, %s2746_s30  ;;  %p2343_p13 = scmp.lt.u32.totalorder %s2757_s29, %s3067_s0 }
  0x95   : > { %p2339_p6 = scmp.ne.s32.totalorder %s2757_s29, %s2338_s25  ;;  %p2344_p0 = scmp.lt.u32.totalorder %s2342_s28, %s2338_s25 }
  0x96   : > { %p2346_p8 = scmp.lt.u32.totalorder %s2338_s25, %s2757_s29 }
  0x97   : > { %p2340_p11 = pnand %p2339_p6, %p1591_p2  ;;  %p2345_p7 = por %p2344_p0, %p2343_p13 }
  0x99   : > { %p2341_p12 = pneg %p2340_p11  ;;  %p2347_p9 = por %p2346_p8, %p2345_p7 }
  0x9b   : > { %p2348_p10 = pnand %p2347_p9, %p2341_p12 }
  0x9d   : > { %2351 = shalt.err (!%p2348_p10)
}
  0x9e   : > { %s2352_s26 = scalar_lea.vmem %s2759_s15, %s2746_s30  ;;  %s2508_s8 = smov [#allocation3]  }
  0x9f   : > { %p2353_p1 = scmp.ne.s32.totalorder %s2759_s15, %s2352_s26  ;;  %s2356_s18 = sshll.u32 %s2508_s8, 4  ;;  %s2357_s18 = int_to_ptr.vmem [resolvable:$false] %s2356_s18 }
  0xa0   : > { %s2358_s16 = scalar_lea.vmem %s2357_s18, 5120  ;;  %p2359_p6 = scmp.lt.s32.totalorder %s2759_s15, %s2357_s18 }
  0xa1   : > { %p2354_p3 = pnand %p2353_p1, %p1591_p2  ;;  %p2360_p11 = scmp.lt.s32.totalorder %s2358_s16, %s2352_s26 }
  0xa3   : > { %p2355_p5 = pneg %p2354_p3  ;;  %p2361_p13 = por %p2360_p11, %p2359_p6 }
  0xa5   : > { %p2362_p0 = pnand %p2361_p13, %p2355_p5 }
  0xa7   : > { %2365 = shalt.err (!%p2362_p0)
}
  0xa8   : > { %s2509_s21 = smov 256   ;;  %s2510_s17 = smov 16  }
  0xa9   : > { %361 = dma.hbm_to_vmem [thread:$0]  (%p1591_p2), %s2757_s29, %s2746_s30, %s2759_s15, %s2749_s14, %s2509_s21, %s2509_s21, %s2510_s17  }
  0xaa PF: > { %p3103_p12 = scmp.ne.s32.totalorder %s3092_s19, 0 }
  0xab   : > { %s365_s27 = sand.u32 (%p3103_p12), 1, %s2500_s12   ;;  %s367_s25 = sand.u32 (%p3103_p12), 1, %s2496_s11  }
  0xac   : > { %364 = sbr.rel (!%p3103_p12) target bundleno = 207 (0xcf), region = 48  ;;  %s2794_s26 = scalar_lea.sflag (%p3103_p12), [#allocation7], %s365_s27 }
  0xad   : > { %s2130_s9 = smul.u32 (%p3103_p12), 80, %s367_s25 }
  0xae   : > { %s370_s22 = smul.u32 (%p3103_p12), 10, %s2500_s12 }
  0xaf   : > { %s369_s30 = scalar_lea.vmem (%p3103_p12), [#allocation6], %s2130_s9 }
  0xb0   : > { %s371_s28 = ssub.s32 (%p3103_p12), 19, %s370_s22 }
  0xb1   : > { %p372_p7 = scmp.lt.s32.totalorder (%p3103_p12), %s371_s28, 10 }
  0xb3   : > { %s3126_s28 = smov (!%p372_p7, %s371_s28), 10 }
  0xb4   : > { %s2791_s24 = sshll.u32 %s3126_s28, 7 }
  0xb5   : > { %s376_s3 = ssub.s32 1280, %s2791_s24 }
  0xb6   : > { %377 = vsyncadd %s2794_s26, %s376_s3  ;;  %p1597_p2 = scmp.ne.s32.totalorder %s2791_s24, 0  ;;  %s1622_s14 = smul.u32 1280, %s2500_s12 }
  0xb7   : > { %s382_s15 = sshll.u32 %s369_s30, 4  ;;  %s2370_s27 = scalar_lea.hbm %s3068_s1, 2432  ;;  %s2804_s15 = int_to_ptr.vmem [resolvable:$true] %s382_s15 }
  0xb8   : > { %s2802_s18 = scalar_lea.hbm %s3068_s1, %s1622_s14 }
  0xb9   : > { %s2366_s16 = scalar_lea.hbm %s2802_s18, %s2791_s24  ;;  %p2371_p1 = scmp.lt.u32.totalorder %s2802_s18, %s3068_s1 }
  0xba   : > { %p2367_p8 = scmp.ne.s32.totalorder %s2802_s18, %s2366_s16  ;;  %p2372_p3 = scmp.lt.u32.totalorder %s2370_s27, %s2366_s16 }
  0xbb   : > { %p2374_p6 = scmp.lt.u32.totalorder %s2366_s16, %s2802_s18 }
  0xbc   : > { %p2368_p9 = pnand %p2367_p8, %p1597_p2  ;;  %p2373_p5 = por %p2372_p3, %p2371_p1 }
  0xbe   : > { %p2369_p10 = pneg %p2368_p9  ;;  %p2375_p11 = por %p2374_p6, %p2373_p5 }
  0xc0   : > { %p2376_p13 = pnand %p2375_p11, %p2369_p10 }
  0xc2   : > { %2379 = shalt.err (!%p2376_p13)
}
  0xc3   : > { %s2380_s22 = scalar_lea.vmem %s2804_s15, %s2791_s24  ;;  %s2511_s28 = smov [#allocation6]  }
  0xc4   : > { %p2381_p0 = scmp.ne.s32.totalorder %s2804_s15, %s2380_s22  ;;  %s2384_s3 = sshll.u32 %s2511_s28, 4  ;;  %s2385_s3 = int_to_ptr.vmem [resolvable:$false] %s2384_s3 }
  0xc5   : > { %s2386_s30 = scalar_lea.vmem %s2385_s3, 2560  ;;  %p2387_p8 = scmp.lt.s32.totalorder %s2804_s15, %s2385_s3 }
  0xc6   : > { %p2382_p12 = pnand %p2381_p0, %p1597_p2  ;;  %p2388_p9 = scmp.lt.s32.totalorder %s2386_s30, %s2380_s22 }
  0xc8   : > { %p2383_p7 = pneg %p2382_p12  ;;  %p2389_p1 = por %p2388_p9, %p2387_p8 }
  0xca   : > { %p2390_p3 = pnand %p2389_p1, %p2383_p7 }
  0xcc   : > { %2393 = shalt.err (!%p2390_p3)
}
  0xcd   : > { %s2512_s14 = smov 128   ;;  %s2513_s29 = smov 8  }
  0xce   : > { %388 = dma.hbm_to_vmem [thread:$0]  (%p1597_p2), %s2802_s18, %s2791_s24, %s2804_s15, %s2794_s26, %s2512_s14, %s2512_s14, %s2513_s29  }
  0xcf PF: > { %p3104_p10 = scmp.ne.s32.totalorder %s3092_s19, 0 }
  0xd0   : > { %s392_s8 = sand.u32 (%p3104_p10), 1, %s2500_s12   ;;  %s394_s16 = sand.u32 (%p3104_p10), 1, %s2496_s11  }
  0xd1   : > { %391 = sbr.rel (!%p3104_p10) target bundleno = 244 (0xf4), region = 52  ;;  %s2839_s22 = scalar_lea.sflag (%p3104_p10), [#allocation7], %s392_s8 }
  0xd2   : > { %s2131_s21 = smul.u32 (%p3104_p10), 80, %s394_s16 }
  0xd3   : > { %s397_s17 = smul.u32 (%p3104_p10), 10, %s2500_s12 }
  0xd4   : > { %s396_s24 = scalar_lea.vmem (%p3104_p10), [#allocation8], %s2131_s21 }
  0xd5   : > { %s398_s27 = ssub.s32 (%p3104_p10), 19, %s397_s17 }
  0xd6   : > { %p399_p5 = scmp.lt.s32.totalorder (%p3104_p10), %s398_s27, 10 }
  0xd8   : > { %s3128_s27 = smov (!%p399_p5, %s398_s27), 10 }
  0xd9   : > { %s2836_s25 = sshll.u32 %s3128_s27, 7 }
  0xda   : > { %s403_s9 = ssub.s32 1280, %s2836_s25 }
  0xdb   : > { %404 = vsyncadd %s2839_s22, %s403_s9  ;;  %p1602_p2 = scmp.ne.s32.totalorder %s2836_s25, 0  ;;  %s1623_s19 = smul.u32 1280, %s2500_s12 }
  0xdc   : > { %s409_s26 = sshll.u32 %s396_s24, 4  ;;  %s2398_s29 = scalar_lea.hbm %s3069_s2, 2432  ;;  %s2849_s26 = int_to_ptr.vmem [resolvable:$true] %s409_s26 }
  0xdd   : > { %s2847_s28 = scalar_lea.hbm %s3069_s2, %s1623_s19 }
  0xde   : > { %s2394_s3 = scalar_lea.hbm %s2847_s28, %s2836_s25  ;;  %p2399_p0 = scmp.lt.u32.totalorder %s2847_s28, %s3069_s2 }
  0xdf   : > { %p2395_p6 = scmp.ne.s32.totalorder %s2847_s28, %s2394_s3  ;;  %p2400_p12 = scmp.lt.u32.totalorder %s2398_s29, %s2394_s3 }
  0xe0   : > { %p2402_p8 = scmp.lt.u32.totalorder %s2394_s3, %s2847_s28 }
  0xe1   : > { %p2396_p11 = pnand %p2395_p6, %p1602_p2  ;;  %p2401_p7 = por %p2400_p12, %p2399_p0 }
  0xe3   : > { %p2397_p13 = pneg %p2396_p11  ;;  %p2403_p9 = por %p2402_p8, %p2401_p7 }
  0xe5   : > { %p2404_p1 = pnand %p2403_p9, %p2397_p13 }
  0xe7   : > { %2407 = shalt.err (!%p2404_p1)
}
  0xe8   : > { %s2408_s21 = scalar_lea.vmem %s2849_s26, %s2836_s25  ;;  %s2514_s17 = smov [#allocation8]  }
  0xe9   : > { %p2409_p3 = scmp.ne.s32.totalorder %s2849_s26, %s2408_s21  ;;  %s2412_s27 = sshll.u32 %s2514_s17, 4  ;;  %s2413_s27 = int_to_ptr.vmem [resolvable:$false] %s2412_s27 }
  0xea   : > { %s2414_s9 = scalar_lea.vmem %s2413_s27, 2560  ;;  %p2415_p6 = scmp.lt.s32.totalorder %s2849_s26, %s2413_s27 }
  0xeb   : > { %p2410_p10 = pnand %p2409_p3, %p1602_p2  ;;  %p2416_p11 = scmp.lt.s32.totalorder %s2414_s9, %s2408_s21 }
  0xed   : > { %p2411_p5 = pneg %p2410_p10  ;;  %p2417_p0 = por %p2416_p11, %p2415_p6 }
  0xef   : > { %p2418_p12 = pnand %p2417_p0, %p2411_p5 }
  0xf1   : > { %2421 = shalt.err (!%p2418_p12)
}
  0xf2   : > { %s2515_s24 = smov 128   ;;  %s2516_s19 = smov 8  }
  0xf3   : > { %415 = dma.hbm_to_vmem [thread:$0]  (%p1602_p2), %s2847_s28, %s2836_s25, %s2849_s26, %s2839_s22, %s2515_s24, %s2515_s24, %s2516_s19  }
  0xf4 PF: > { %p3105_p13 = scmp.ne.s32.totalorder %s3098_s23, 0 }
  0xf5   : > { %s2879_s15 = sand.u32 (!%p3105_p13), 1, %s2492_s10   ;;  %p3106_p7 = scmp.ne.s32.totalorder (!%p3105_p13), %s3093_s20, 0 }
  0xf6   : > { %421 = sbr.rel (%p3105_p13) target bundleno = 812 (0x32c), region = 56  ;;  %s424_s3 = scalar_lea.sflag (!%p3105_p13), [#allocation4], %s2879_s15 }
  0xf7   : > { %s2132_s18 = smul.u32 (!%p3105_p13), 160, %s2879_s15 }
  0xf9   : > { %s2883_s30 = scalar_lea.vmem (!%p3105_p13), [#allocation3], %s2132_s18 }
  0xfd   : > { %2467 = dma.done.wait (%p3106_p7), %s424_s3, 2560  }
  0xfe   : > { %2469 = vsyncadd (%p3106_p7), %s424_s3, 4294964736  ;;  %s432_s23 = sand.u32 1, %s2591_s13   ;;  %s2891_s25 = smul.u32 80, %s2879_s15 }
  0xff   : > { %s433_s22 = scalar_lea.sflag [#allocation7], %s432_s23 }
 0x100   : > { %s2894_s26 = scalar_lea.vmem [#allocation6], %s2891_s25 }
 0x101   : > { %2471 = dma.done.wait (%p3106_p7), %s433_s22, 2560  }
 0x102   : > { %2473 = vsyncadd (%p3106_p7), %s433_s22, 4294964736  ;;  %s2901_s28 = scalar_lea.vmem [#allocation8], %s2891_s25  ;;  %p3107_p2 = scmp.eq.s32.totalorder %s2591_s13, 0 }
 0x104   : > { %2475 = dma.done.wait (%p3107_p2), [#allocation10], 6144   ;;  %p3108_p8 = pmov %p3107_p2 }
 0x105   : > { %p3109_p9 = pmov %p3107_p2 }
 0x106   : > { %2477 = vsyncadd (%p3108_p8), [#allocation10], 4294961152 }
 0x107   : > { %2479 = dma.done.wait (%p3109_p9), [#allocation13], 8192   ;;  %p3110_p1 = pmov %p3107_p2 }
 0x108   : > { %v563_v0 = vld [vmem:[#allocation9 + $0x80] sm:$0xff]  ;;  %v564_v1 = vld [vmem:[#allocation9 + $0x88] sm:$0xff]  ;;  %v565_v9 = vld [vmem:[#allocation9 + $0x90] sm:$0xff]  ;;  %s3111_s16 = sld [smem:[#allocation27_spill]]  ;;  %s2992_s21 = scalar_lea.vmem [#allocation15], %s2891_s25 }
 0x109   : > { %2481 = vsyncadd (%p3110_p1), [#allocation13], 4294959104  ;;  %v714_v2 = vld [vmem:[#allocation11] sm:$0xff]  ;;  %v1969_v3 = vpack.c.bf16 %v564_v1, %v563_v0  ;;  %v715_v4 = vld [vmem:[#allocation11 + $0x8] sm:$0xff]  ;;  %s1409_s17 = scalar_lea.sflag [#allocation5], %s2879_s15  ;;  %s3112_s27 = sld [smem:[#allocation24_spill]] }
 0x10a   : > { %v547_v5 = vld [vmem:[#allocation9] sm:$0xff]  ;;  %v548_v6 = vld [vmem:[#allocation9 + $0x8] sm:$0xff]  ;;  %v2001_v7 = vpack.c.bf16 %v715_v4, %v714_v2  ;;  %v566_v10 = vld [vmem:[#allocation9 + $0x98] sm:$0xff] }
 0x10b   : > { %v1971_v8 = vpack.c.bf16 %v548_v6, %v547_v5  ;;  %v716_v11 = vld [vmem:[#allocation11 + $0x10] sm:$0xff]  ;;  %1970 = vmatprep.subr.bf16.mxu0 %v1969_v3  ;;  %v1973_v12 = vpack.c.bf16 %v566_v10, %v565_v9  ;;  %v717_v13 = vld [vmem:[#allocation11 + $0x18] sm:$0xff]  ;;  %v567_v18 = vld [vmem:[#allocation9 + $0xa0] sm:$0xff] }
 0x10c   : > { %v549_v14 = vld [vmem:[#allocation9 + $0x10] sm:$0xff]  ;;  %v550_v15 = vld [vmem:[#allocation9 + $0x18] sm:$0xff]  ;;  %2002 = vmatprep.subr.bf16.mxu1 %v2001_v7  ;;  %v2005_v16 = vpack.c.bf16 %v717_v13, %v716_v11  ;;  %v568_v19 = vld [vmem:[#allocation9 + $0xa8] sm:$0xff] }
 0x10d   : > { %1972 = vmatpush3.bf16.msra.mxu0 %v1971_v8  ;;  %v1975_v17 = vpack.c.bf16 %v550_v15, %v549_v14  ;;  %v718_v20 = vld [vmem:[#allocation11 + $0x20] sm:$0xff]  ;;  %2004 = vmatpush3.bf16.msra.mxu1 %v2001_v7  ;;  %v1977_v21 = vpack.c.bf16 %v568_v19, %v567_v18  ;;  %v719_v22 = vld [vmem:[#allocation11 + $0x28] sm:$0xff]  ;;  %v569_v26 = vld [vmem:[#allocation9 + $0xb0] sm:$0xff] }
 0x10e   : > { %1974 = vmatprep.subr.bf16.mxu0 %v1973_v12  ;;  %v551_v23 = vld [vmem:[#allocation9 + $0x20] sm:$0xff]  ;;  %v552_v24 = vld [vmem:[#allocation9 + $0x28] sm:$0xff]  ;;  %2006 = vmatprep.subr.bf16.mxu1 %v2005_v16  ;;  %v2009_v25 = vpack.c.bf16 %v719_v22, %v718_v20  ;;  %v570_v27 = vld [vmem:[#allocation9 + $0xb8] sm:$0xff] }
 0x10f   : > { %v720_v28 = vld [vmem:[#allocation11 + $0x30] sm:$0xff]  ;;  %v721_v29 = vld [vmem:[#allocation11 + $0x38] sm:$0xff]  ;;  %v1979_v30 = vpack.c.bf16 %v552_v24, %v551_v23  ;;  %v1981_v31 = vpack.c.bf16 %v570_v27, %v569_v26  ;;  %v571_v35 = vld [vmem:[#allocation9 + $0xc0] sm:$0xff]  ;;  %p3113_p3 = scmp.ne.s32.totalorder %s3112_s27, 0 }
 0x110   : > { %v553_v32 = vld [vmem:[#allocation9 + $0x30] sm:$0xff]  ;;  %v554_v33 = vld [vmem:[#allocation9 + $0x38] sm:$0xff]  ;;  %v2013_v34 = vpack.c.bf16 %v721_v29, %v720_v28  ;;  %v572_v36 = vld [vmem:[#allocation9 + $0xc8] sm:$0xff]  ;;  %s1416_s9 = smul.u32 (%p3113_p3), 10, %s2591_s13 }
 0x111   : > { %1976 = vmatpush3.bf16.msra.mxu0 %v1975_v17  ;;  %2008 = vmatpush3.bf16.msra.mxu1 %v2005_v16  ;;  %v722_v37 = vld [vmem:[#allocation11 + $0x40] sm:$0xff]  ;;  %v723_v38 = vld [vmem:[#allocation11 + $0x48] sm:$0xff]  ;;  %v1983_v39 = vpack.c.bf16 %v554_v33, %v553_v32  ;;  %v1985_v40 = vpack.c.bf16 %v572_v36, %v571_v35  ;;  %v573_v44 = vld [vmem:[#allocation9 + $0xd0] sm:$0xff] }
 0x112   : > { %1978 = vmatprep.subr.bf16.mxu0 %v1977_v21  ;;  %2010 = vmatprep.subr.bf16.mxu1 %v2009_v25  ;;  %v555_v41 = vld [vmem:[#allocation9 + $0x40] sm:$0xff]  ;;  %v556_v42 = vld [vmem:[#allocation9 + $0x48] sm:$0xff]  ;;  %v2017_v43 = vpack.c.bf16 %v723_v38, %v722_v37  ;;  %v574_v45 = vld [vmem:[#allocation9 + $0xd8] sm:$0xff]  ;;  %s1417_s24 = ssub.s32 (%p3113_p3), 19, %s1416_s9 }
 0x113   : > { %v724_v46 = vld [vmem:[#allocation11 + $0x50] sm:$0xff]  ;;  %v725_v47 = vld [vmem:[#allocation11 + $0x58] sm:$0xff]  ;;  %v1987_v48 = vpack.c.bf16 %v556_v42, %v555_v41  ;;  %v528_v49 = vld [vmem:[%s2883_s30 + $0x8] sm:$0xff]  ;;  %v1989_v51 = vpack.c.bf16 %v574_v45, %v573_v44  ;;  %p1418_p10 = scmp.lt.s32.totalorder (%p3113_p3), %s1417_s24, 10 }
 0x114   : > { %v704_v50 = vld [vmem:[%s2894_s26] sm:$0xff]  ;;  %v558_v53 = vld [vmem:[#allocation9 + $0x58] sm:$0xff]  ;;  %v2021_v54 = vpack.c.bf16 %v725_v47, %v724_v46  ;;  %v576_v56 = vld [vmem:[#allocation9 + $0xe8] sm:$0xff]  ;;  %643 = vmatprep.mubr.f32.mxu0 %v528_v49 }
 0x115   : > { %1980 = vmatpush3.bf16.msra.mxu0 %v1979_v30  ;;  %2012 = vmatpush3.bf16.msra.mxu1 %v2009_v25  ;;  %v557_v52 = vld [vmem:[#allocation9 + $0x50] sm:$0xff]  ;;  %v575_v55 = vld [vmem:[#allocation9 + $0xe0] sm:$0xff]  ;;  %v727_v58 = vld [vmem:[#allocation11 + $0x68] sm:$0xff] }
 0x116   : > { %1982 = vmatprep.subr.bf16.mxu0 %v1981_v31  ;;  %2014 = vmatprep.subr.bf16.mxu1 %v2013_v34  ;;  %v726_v57 = vld [vmem:[#allocation11 + $0x60] sm:$0xff]  ;;  %v1991_v59 = vpack.c.bf16 %v558_v53, %v557_v52  ;;  %v1993_v60 = vpack.c.bf16 %v576_v56, %v575_v55  ;;  %v560_v62 = vld [vmem:[#allocation9 + $0x68] sm:$0xff]  ;;  %v577_v0 = vld [vmem:[#allocation9 + $0xf0] sm:$0xff] }
 0x117   : > { %1860 = vmatprep.mubr.f32.mxu1 %v704_v50  ;;  %v559_v61 = vld [vmem:[#allocation9 + $0x60] sm:$0xff]  ;;  %v2025_v63 = vpack.c.bf16 %v727_v58, %v726_v57  ;;  %v578_v1 = vld [vmem:[#allocation9 + $0xf8] sm:$0xff]  ;;  %v728_v2 = vld [vmem:[#allocation11 + $0x70] sm:$0xff] }
 0x118   : > { %v729_v3 = vld [vmem:[#allocation11 + $0x78] sm:$0xff]  ;;  %v1995_v4 = vpack.c.bf16 %v560_v62, %v559_v61  ;;  %v1997_v5 = vpack.c.bf16 %v578_v1, %v577_v0  ;;  %v561_v6 = vld [vmem:[#allocation9 + $0x70] sm:$0xff]  ;;  %v865_v9 = vld [vmem:[#allocation12] sm:$0xff] }
 0x119   : > { %1984 = vmatpush3.bf16.msra.mxu0 %v1983_v39  ;;  %2016 = vmatpush3.bf16.msra.mxu1 %v2013_v34  ;;  %v562_v7 = vld [vmem:[#allocation9 + $0x78] sm:$0xff]  ;;  %v2029_v8 = vpack.c.bf16 %v729_v3, %v728_v2  ;;  %v866_v10 = vld [vmem:[#allocation12 + $0x8] sm:$0xff]  ;;  %v867_v13 = vld [vmem:[#allocation12 + $0x10] sm:$0xff] }
 0x11a   : > { %1986 = vmatprep.subr.bf16.mxu0 %v1985_v40  ;;  %2018 = vmatprep.subr.bf16.mxu1 %v2017_v43  ;;  %v1999_v11 = vpack.c.bf16 %v562_v7, %v561_v6  ;;  %v2033_v12 = vpack.c.bf16 %v866_v10, %v865_v9  ;;  %v868_v14 = vld [vmem:[#allocation12 + $0x18] sm:$0xff]  ;;  %v527_v15 = vld [vmem:[%s2883_s30] sm:$0xff]  ;;  %v870_v21 = vld [vmem:[#allocation12 + $0x28] sm:$0xff] }
 0x11b   : > { %v705_v16 = vld [vmem:[%s2894_s26 + $0x8] sm:$0xff]  ;;  %v706_v18 = vld [vmem:[%s2894_s26 + $0x10] sm:$0xff]  ;;  %v2037_v19 = vpack.c.bf16 %v868_v14, %v867_v13  ;;  %v707_v31 = vld [vmem:[%s2894_s26 + $0x18] sm:$0xff] }
 0x11c   : > { %v530_v17 = vld [vmem:[%s2883_s30 + $0x18] sm:$0xff]  ;;  %v869_v20 = vld [vmem:[#allocation12 + $0x20] sm:$0xff]  ;;  %v1130_v23 = vld [vmem:[#allocation14 + $0x88] sm:$0xff] }
 0x11d   : > { %1988 = vmatpush3.bf16.msra.mxu0 %v1987_v48  ;;  %2020 = vmatpush3.bf16.msra.mxu1 %v2017_v43  ;;  %v1129_v22 = vld [vmem:[#allocation14 + $0x80] sm:$0xff]  ;;  %v1114_v25 = vld [vmem:[#allocation14 + $0x8] sm:$0xff]  ;;  %v529_v26 = vld [vmem:[%s2883_s30 + $0x10] sm:$0xff]  ;;  %v2041_v32 = vpack.c.bf16 %v870_v21, %v869_v20 }
 0x11e   : > { %1990 = vmatprep.subr.bf16.mxu0 %v1989_v51  ;;  %2022 = vmatprep.subr.bf16.mxu1 %v2021_v54  ;;  %v1113_v24 = vld [vmem:[#allocation14] sm:$0xff]  ;;  %v2065_v27 = vpack.c.bf16 %v1130_v23, %v1129_v22  ;;  %v1131_v28 = vld [vmem:[#allocation14 + $0x90] sm:$0xff]  ;;  %v1132_v29 = vld [vmem:[#allocation14 + $0x98] sm:$0xff] }
 0x11f   : > { %v532_v30 = vld [vmem:[%s2883_s30 + $0x28] sm:$0xff]  ;;  %v871_v33 = vld [vmem:[#allocation12 + $0x30] sm:$0xff]  ;;  %v2067_v35 = vpack.c.bf16 %v1114_v25, %v1113_v24  ;;  %v872_v36 = vld [vmem:[#allocation12 + $0x38] sm:$0xff]  ;;  %v2069_v37 = vpack.c.bf16 %v1132_v29, %v1131_v28 }
 0x120   : > { %v708_v34 = vld [vmem:[%s2894_s26 + $0x20] sm:$0xff]  ;;  %v1116_v39 = vld [vmem:[#allocation14 + $0x18] sm:$0xff]  ;;  %v1134_v42 = vld [vmem:[#allocation14 + $0xa8] sm:$0xff]  ;;  %v2045_v45 = vpack.c.bf16 %v872_v36, %v871_v33 }
 0x121   : > { %1992 = vmatpush3.bf16.msra.mxu0 %v1991_v59  ;;  %2024 = vmatpush3.bf16.msra.mxu1 %v2021_v54  ;;  %v1115_v38 = vld [vmem:[#allocation14 + $0x10] sm:$0xff]  ;;  %v531_v40 = vld [vmem:[%s2883_s30 + $0x20] sm:$0xff]  ;;  %v534_v43 = vld [vmem:[%s2883_s30 + $0x38] sm:$0xff] }
 0x122   : > { %1994 = vmatprep.subr.bf16.mxu0 %v1993_v60  ;;  %2026 = vmatprep.subr.bf16.mxu1 %v2025_v63  ;;  %v1133_v41 = vld [vmem:[#allocation14 + $0xa0] sm:$0xff]  ;;  %v709_v44 = vld [vmem:[%s2894_s26 + $0x28] sm:$0xff]  ;;  %v2071_v48 = vpack.c.bf16 %v1116_v39, %v1115_v38  ;;  %v533_v53 = vld [vmem:[%s2883_s30 + $0x30] sm:$0xff] }
 0x123   : > { %v873_v46 = vld [vmem:[#allocation12 + $0x40] sm:$0xff]  ;;  %v874_v49 = vld [vmem:[#allocation12 + $0x48] sm:$0xff]  ;;  %v2073_v50 = vpack.c.bf16 %v1134_v42, %v1133_v41  ;;  %v1135_v54 = vld [vmem:[#allocation14 + $0xb0] sm:$0xff] }
 0x124   : > { %v710_v47 = vld [vmem:[%s2894_s26 + $0x30] sm:$0xff]  ;;  %v1118_v52 = vld [vmem:[#allocation14 + $0x28] sm:$0xff]  ;;  %v1136_v55 = vld [vmem:[#allocation14 + $0xb8] sm:$0xff]  ;;  %v2049_v58 = vpack.c.bf16 %v874_v49, %v873_v46 }
 0x125   : > { %1996 = vmatpush3.bf16.msra.mxu0 %v1995_v4  ;;  %2028 = vmatpush3.bf16.msra.mxu1 %v2025_v63  ;;  %v1117_v51 = vld [vmem:[#allocation14 + $0x20] sm:$0xff]  ;;  %v536_v56 = vld [vmem:[%s2883_s30 + $0x48] sm:$0xff]  ;;  %v875_v59 = vld [vmem:[#allocation12 + $0x50] sm:$0xff]  ;;  %v2077_v63 = vpack.c.bf16 %v1136_v55, %v1135_v54 }
 0x126   : > { %1998 = vmatprep.subr.bf16.mxu0 %v1997_v5  ;;  %2030 = vmatprep.subr.bf16.mxu1 %v2029_v8  ;;  %v711_v57 = vld [vmem:[%s2894_s26 + $0x38] sm:$0xff]  ;;  %v712_v60 = vld [vmem:[%s2894_s26 + $0x40] sm:$0xff]  ;;  %v2075_v61 = vpack.c.bf16 %v1118_v52, %v1117_v51  ;;  %v713_v6 = vld [vmem:[%s2894_s26 + $0x48] sm:$0xff] }
 0x127   : > { %v876_v62 = vld [vmem:[#allocation12 + $0x58] sm:$0xff]  ;;  %v1119_v0 = vld [vmem:[#allocation14 + $0x30] sm:$0xff]  ;;  %v535_v2 = vld [vmem:[%s2883_s30 + $0x40] sm:$0xff] }
 0x128   : > { %v1120_v1 = vld [vmem:[#allocation14 + $0x38] sm:$0xff]  ;;  %v1137_v3 = vld [vmem:[#allocation14 + $0xc0] sm:$0xff]  ;;  %v1138_v4 = vld [vmem:[#allocation14 + $0xc8] sm:$0xff]  ;;  %v2053_v7 = vpack.c.bf16 %v876_v62, %v875_v59 }
 0x129   : > { %2000 = vmatpush3.bf16.msra.mxu0 %v1999_v11  ;;  %2032 = vmatpush3.bf16.msra.mxu1 %v2029_v8  ;;  %v538_v5 = vld [vmem:[%s2883_s30 + $0x58] sm:$0xff]  ;;  %v877_v8 = vld [vmem:[#allocation12 + $0x60] sm:$0xff]  ;;  %v2079_v10 = vpack.c.bf16 %v1120_v1, %v1119_v0  ;;  %v878_v11 = vld [vmem:[#allocation12 + $0x68] sm:$0xff] }
 0x12a   : > { %2034 = vmatprep.subr.bf16.mxu1 %v2033_v12  ;;  %2066 = vmatprep.subr.bf16.mxu0 %v2065_v27  ;;  %v855_v9 = vld [vmem:[%s2901_s28] sm:$0xff]  ;;  %v1122_v14 = vld [vmem:[#allocation14 + $0x48] sm:$0xff]  ;;  %v880_v22 = vld [vmem:[#allocation12 + $0x78] sm:$0xff] }
 0x12b   : > { %v1121_v13 = vld [vmem:[#allocation14 + $0x40] sm:$0xff]  ;;  %v879_v20 = vld [vmem:[#allocation12 + $0x70] sm:$0xff]  ;;  %v1124_v25 = vld [vmem:[#allocation14 + $0x58] sm:$0xff] }
 0x12c   : > { %644 = vmatmul.mubr.f32.vlgmr.msra.gmra.mrb[0].mxu0 %v527_v15  ;;  %1861 = vmatmul.mubr.f32.vlgmr.msra.gmra.mrb[0].mxu1 %v705_v16  ;;  %v537_v15 = vld [vmem:[%s2883_s30 + $0x50] sm:$0xff]  ;;  %v2083_v21 = vpack.c.bf16 %v1122_v14, %v1121_v13  ;;  %v542_v27 = vld [vmem:[%s2883_s30 + $0x78] sm:$0xff]  ;;  %v2061_v28 = vpack.c.bf16 %v880_v22, %v879_v20  ;;  %v1149_v62 = vld [vmem:[#allocation14 + $0x120] sm:$0xff] }
 0x12d   : > { %648 = vmatprep.mubr.f32.mxu0 %v530_v17  ;;  %2036 = vmatpush3.bf16.msra.mxu1 %v2033_v12  ;;  %v2081_v12 = vpack.c.bf16 %v1138_v4, %v1137_v3  ;;  %v1139_v16 = vld [vmem:[#allocation14 + $0xd0] sm:$0xff]  ;;  %v1140_v17 = vld [vmem:[#allocation14 + $0xd8] sm:$0xff]  ;;  %v1153_v4 = vld [vmem:[#allocation14 + $0x140] sm:$0xff] }
 0x12e   : > { %1863 = vmatprep.mubr.f32.mxu1 %v706_v18  ;;  %2038 = vmatprep.subr.bf16.mxu1 %v2037_v19  ;;  %v540_v18 = vld [vmem:[%s2883_s30 + $0x68] sm:$0xff]  ;;  %v2085_v23 = vpack.c.bf16 %v1140_v17, %v1139_v16  ;;  %v1123_v24 = vld [vmem:[#allocation14 + $0x50] sm:$0xff]  ;;  %v1144_v51 = vld [vmem:[#allocation14 + $0xf8] sm:$0xff]  ;;  %v1038_v16 = vlaneseq }
 0x12f   : > { %2068 = vmatpush3.bf16.msra.mxu0 %v2067_v35  ;;  %v2087_v29 = vpack.c.bf16 %v1124_v25, %v1123_v24  ;;  %v856_v33 = vld [vmem:[%s2901_s28 + $0x8] sm:$0xff]  ;;  %v857_v35 = vld [vmem:[%s2901_s28 + $0x10] sm:$0xff]  ;;  %v859_v38 = vld [vmem:[%s2901_s28 + $0x20] sm:$0xff] }
 0x130   : > { %649 = vmatmul.mubr.f32.gmra.mrb[2].mxu0 %v529_v26  ;;  %1864 = vmatmul.mubr.f32.gmra.mrb[2].mxu1 %v707_v31  ;;  %v539_v26 = vld [vmem:[%s2883_s30 + $0x60] sm:$0xff]  ;;  %v544_v31 = vld [vmem:[%s2883_s30 + $0x88] sm:$0xff]  ;;  %v545_v36 = vld [vmem:[%s2883_s30 + $0x90] sm:$0xff]  ;;  %v2951_v17 = vshrl.u32 %v1038_v16, 7 }
 0x131   : > { %653 = vmatprep.mubr.f32.mxu0 %v532_v30  ;;  %2040 = vmatpush3.bf16.msra.mxu1 %v2037_v19  ;;  %v2057_v19 = vpack.c.bf16 %v878_v11, %v877_v8  ;;  %v541_v30 = vld [vmem:[%s2883_s30 + $0x70] sm:$0xff]  ;;  %v860_v39 = vld [vmem:[%s2901_s28 + $0x28] sm:$0xff]  ;;  %v862_v41 = vld [vmem:[%s2901_s28 + $0x38] sm:$0xff] }
 0x132   : > { %1866 = vmatprep.mubr.f32.mxu1 %v708_v34  ;;  %2042 = vmatprep.subr.bf16.mxu1 %v2041_v32  ;;  %v546_v34 = vld [vmem:[%s2883_s30 + $0x98] sm:$0xff]  ;;  %v863_v42 = vld [vmem:[%s2901_s28 + $0x40] sm:$0xff]  ;;  %v1158_v11 = vld [vmem:[#allocation14 + $0x168] sm:$0xff]  ;;  %v1040_v20 = vsub.s32 0, %v2951_v17  ;;  %v1048_v16 = vsub.s32 2, %v2951_v17 }
 0x133   : > { %2070 = vmatprep.subr.bf16.mxu0 %v2069_v37  ;;  %v858_v37 = vld [vmem:[%s2901_s28 + $0x18] sm:$0xff]  ;;  %v1147_v59 = vld [vmem:[#allocation14 + $0x110] sm:$0xff] }
 0x134   : > { %654 = vmatmul.mubr.f32.gmra.mrb[4].mxu0 %v531_v40  ;;  %1867 = vmatmul.mubr.f32.gmra.mrb[4].mxu1 %v709_v44  ;;  %v861_v40 = vld [vmem:[%s2901_s28 + $0x30] sm:$0xff]  ;;  %v1128_v54 = vld [vmem:[#allocation14 + $0x78] sm:$0xff] }
 0x135   : > { %658 = vmatprep.mubr.f32.mxu0 %v534_v43  ;;  %2044 = vmatpush3.bf16.msra.mxu1 %v2041_v32  ;;  %v543_v32 = vld [vmem:[%s2883_s30 + $0x80] sm:$0xff]  ;;  %v864_v43 = vld [vmem:[%s2901_s28 + $0x48] sm:$0xff]  ;;  %v1151_v1 = vld [vmem:[#allocation14 + $0x130] sm:$0xff] }
 0x136   : > { %1869 = vmatprep.mubr.f32.mxu1 %v710_v47  ;;  %2046 = vmatprep.subr.bf16.mxu1 %v2045_v45  ;;  %v1141_v44 = vld [vmem:[#allocation14 + $0xe0] sm:$0xff]  ;;  %v1156_v8 = vld [vmem:[#allocation14 + $0x158] sm:$0xff]  ;;  %v1159_v13 = vld [vmem:[#allocation14 + $0x170] sm:$0xff] }
 0x137   : > { %2072 = vmatpush3.bf16.msra.mxu0 %v2071_v48  ;;  %v1125_v47 = vld [vmem:[#allocation14 + $0x60] sm:$0xff]  ;;  %v1126_v48 = vld [vmem:[#allocation14 + $0x68] sm:$0xff]  ;;  %v1160_v14 = vld [vmem:[#allocation14 + $0x178] sm:$0xff] }
 0x138   : > { %659 = vmatmul.mubr.f32.gmra.mrb[6].mxu0 %v533_v53  ;;  %2074 = vmatprep.subr.bf16.mxu0 %v2073_v50  ;;  %v2091_v49 = vpack.c.bf16 %v1126_v48, %v1125_v47  ;;  %v1143_v50 = vld [vmem:[#allocation14 + $0xf0] sm:$0xff] }
 0x139   : > { %663 = vmatprep.mubr.f32.mxu0 %v536_v56  ;;  %1870 = vmatmul.mubr.f32.gmra.mrb[6].mxu1 %v711_v57  ;;  %v2093_v52 = vpack.c.bf16 %v1144_v51, %v1143_v50  ;;  %v1127_v53 = vld [vmem:[#allocation14 + $0x70] sm:$0xff]  ;;  %v1145_v56 = vld [vmem:[#allocation14 + $0x100] sm:$0xff]  ;;  %v1146_v57 = vld [vmem:[#allocation14 + $0x108] sm:$0xff] }
 0x13a   : > { %2048 = vmatpush3.bf16.msra.mxu1 %v2045_v45  ;;  %1872 = vmatprep.mubr.f32.mxu1 %v712_v60  ;;  %v1142_v45 = vld [vmem:[#allocation14 + $0xe8] sm:$0xff]  ;;  %v2095_v55 = vpack.c.bf16 %v1128_v54, %v1127_v53  ;;  %v1148_v60 = vld [vmem:[#allocation14 + $0x118] sm:$0xff] }
 0x13b   : > { %2050 = vmatprep.subr.bf16.mxu1 %v2049_v58  ;;  %2076 = vmatpush3.bf16.msra.mxu0 %v2075_v61  ;;  %v2089_v46 = vpack.c.bf16 %v1142_v45, %v1141_v44  ;;  %v2101_v61 = vpack.c.bf16 %v1148_v60, %v1147_v59 }
 0x13c   : > { %664 = vmatmul.mubr.f32.gmra.mrb[8].mxu0 %v535_v2  ;;  %2078 = vmatprep.subr.bf16.mxu0 %v2077_v63  ;;  %v1150_v63 = vld [vmem:[#allocation14 + $0x128] sm:$0xff]  ;;  %v1152_v2 = vld [vmem:[#allocation14 + $0x138] sm:$0xff] }
 0x13d   : > { %668 = vmatprep.mubr.f32.mxu0 %v538_v5  ;;  %1873 = vmatmul.mubr.f32.gmra.mrb[8].mxu1 %v713_v6  ;;  %v2105_v0 = vpack.c.bf16 %v1150_v63, %v1149_v62  ;;  %v2109_v3 = vpack.c.bf16 %v1152_v2, %v1151_v1  ;;  %v1154_v5 = vld [vmem:[#allocation14 + $0x148] sm:$0xff] }
 0x13e   : > { %2052 = vmatpush3.bf16.msra.mxu1 %v2049_v58  ;;  %1907 = vmatprep.mubr.f32.mxu1 %v855_v9  ;;  %v2097_v58 = vpack.c.bf16 %v1146_v57, %v1145_v56  ;;  %v2113_v6 = vpack.c.bf16 %v1154_v5, %v1153_v4 }
 0x13f   : > { %2054 = vmatprep.subr.bf16.mxu1 %v2053_v7  ;;  %2080 = vmatpush3.bf16.msra.mxu0 %v2079_v10  ;;  %v1157_v10 = vld [vmem:[#allocation14 + $0x160] sm:$0xff] }
 0x140   : > { %669 = vmatmul.mubr.f32.gmra.mrb[10].mxu0 %v537_v15  ;;  %2082 = vmatprep.subr.bf16.mxu0 %v2081_v12  ;;  %v2121_v12 = vpack.c.bf16 %v1158_v11, %v1157_v10  ;;  %v2125_v15 = vpack.c.bf16 %v1160_v14, %v1159_v13 }
 0x141   : > { %673 = vmatprep.mubr.f32.mxu0 %v540_v18  ;;  %v1044_v18 = vsub.s32 1, %v2951_v17 }
 0x142   : > { %2056 = vmatpush3.bf16.msra.mxu1 %v2053_v7  ;;  %v1155_v7 = vld [vmem:[#allocation14 + $0x150] sm:$0xff] }
 0x143   : > { %2058 = vmatprep.subr.bf16.mxu1 %v2057_v19  ;;  %2084 = vmatpush3.bf16.msra.mxu0 %v2083_v21  ;;  %v2117_v9 = vpack.c.bf16 %v1156_v8, %v1155_v7 }
 0x144   : > { %674 = vmatmul.mubr.f32.gmra.mrb[12].mxu0 %v539_v26  ;;  %2086 = vmatprep.subr.bf16.mxu0 %v2085_v23 }
 0x145   : > { %678 = vmatprep.mubr.f32.mxu0 %v542_v27 }
 0x146   : > { %2060 = vmatpush3.bf16.msra.mxu1 %v2057_v19  ;;  %v2957_v19 = vld [vmem:[%s3073_s6] sm:$0x7] }
 0x147   : > { %2062 = vmatprep.subr.bf16.mxu1 %v2061_v28  ;;  %2088 = vmatpush3.bf16.msra.mxu0 %v2087_v29  ;;  %v2961_v21 = vrot.slane %v2957_v19, %v1044_v18  ;;  %v2964_v23 = vrot.slane %v2957_v19, %v1040_v20 }
 0x148   : > { %679 = vmatmul.mubr.f32.gmra.mrb[14].mxu0 %v541_v30  ;;  %2090 = vmatprep.subr.bf16.mxu0 %v2089_v46 }
 0x149   : > { %683 = vmatprep.mubr.f32.mxu0 %v544_v31 }
 0x14a   : > { %2064 = vmatpush3.bf16.msra.mxu1 %v2061_v28 }
 0x14b   : > { %2092 = vmatpush3.bf16.msra.mxu0 %v2091_v49  ;;  %2098 = vmatprep.subr.bf16.mxu1 %v2097_v58 }
 0x14c   : > { %684 = vmatmul.mubr.f32.gmra.mrb[16].mxu0 %v543_v32  ;;  %2094 = vmatprep.subr.bf16.mxu0 %v2093_v52 }
 0x14d   : > { %1908 = vmatmul.mubr.f32.vlgmr.msra.gmra.mrb[10].mxu1 %v856_v33  ;;  %688 = vmatprep.mubr.f32.mxu0 %v546_v34 }
 0x14e   : > { %1910 = vmatprep.mubr.f32.mxu1 %v857_v35  ;;  %2100 = vmatpush3.bf16.msra.mxu1 %v2097_v58 }
 0x14f   : > { %2096 = vmatpush3.bf16.msra.mxu0 %v2095_v55  ;;  %2102 = vmatprep.subr.bf16.mxu1 %v2101_v61 }
 0x150   : > { %689 = vmatmul.mubr.f32.gmra.mrb[18].mxu0 %v545_v36 }
 0x151   : > { %1911 = vmatmul.mubr.f32.gmra.mrb[12].mxu1 %v858_v37 }
 0x152   : > { %1913 = vmatprep.mubr.f32.mxu1 %v859_v38  ;;  %2104 = vmatpush3.bf16.msra.mxu1 %v2101_v61 }
 0x153   : > { %2106 = vmatprep.subr.bf16.mxu1 %v2105_v0 }
 0x155   : > { %1914 = vmatmul.mubr.f32.gmra.mrb[14].mxu1 %v860_v39 }
 0x156   : > { %1916 = vmatprep.mubr.f32.mxu1 %v861_v40  ;;  %2108 = vmatpush3.bf16.msra.mxu1 %v2105_v0 }
 0x157   : > { %2110 = vmatprep.subr.bf16.mxu1 %v2109_v3 }
 0x159   : > { %1917 = vmatmul.mubr.f32.gmra.mrb[16].mxu1 %v862_v41 }
 0x15a   : > { %1919 = vmatprep.mubr.f32.mxu1 %v863_v42  ;;  %2112 = vmatpush3.bf16.msra.mxu1 %v2109_v3 }
 0x15b   : > { %2114 = vmatprep.subr.bf16.mxu1 %v2113_v6 }
 0x15d   : > { %1920 = vmatmul.mubr.f32.gmra.mrb[18].mxu1 %v864_v43 }
 0x15e   : > { %2116 = vmatpush3.bf16.msra.mxu1 %v2113_v6 }
 0x15f   : > { %2118 = vmatprep.subr.bf16.mxu1 %v2117_v9 }
 0x162   : > { %2120 = vmatpush3.bf16.msra.mxu1 %v2117_v9 }
 0x163   : > { %2122 = vmatprep.subr.bf16.mxu1 %v2121_v12 }
 0x166   : > { %2124 = vmatpush3.bf16.msra.mxu1 %v2121_v12 }
 0x167   : > { %2126 = vmatprep.subr.bf16.mxu1 %v2125_v15 }
 0x16a   : > { %2128 = vmatpush3.bf16.msra.mxu1 %v2125_v15 }
 0x1ff   : > { %v1658_v22 = vpop.f32.mrb[0].mxu0  ;;  %v1862_v24 = vpop.f32.mrb[0].mxu1 }
 0x200   : > { %v1659_v25 = vpop.f32.mrb[1].mxu0  ;;  %v796_v27 = vpop.f32.mrb[1].mxu1  ;;  %v1057_v28 = vadd.f32 %v1862_v24, %v2961_v21 }
 0x201   : > { %v1660_v26 = vadd.f32 %v1659_v25, %v1658_v22  ;;  %v1054_v29 = vadd.f32 %v2961_v21, %v796_v27  ;;  %v1049_v27 = vrot.slane %v2957_v19, %v1048_v16 }
 0x202   : > { %v1087_v38 = vmax.f32 %v1057_v28, 0.0 }
 0x203   : > { %v1053_v30 = vadd.f32 %v1660_v26, %v2964_v23  ;;  %v1661_v31 = vpop.f32.mrb[2].mxu0  ;;  %v1084_v32 = vmax.f32 %v1054_v29, 0.0  ;;  %v1865_v34 = vpop.f32.mrb[2].mxu1 }
 0x204   : > { %v1662_v33 = vpop.f32.mrb[3].mxu0  ;;  %v806_v37 = vpop.f32.mrb[3].mxu1  ;;  %v1063_v43 = vadd.f32 %v1865_v34, %v2961_v21 }
 0x205   : > { %v1083_v35 = vmax.f32 %v1053_v30, 0.0  ;;  %v1663_v36 = vadd.f32 %v1662_v33, %v1661_v31  ;;  %1232 = vmatprep.mubr.f32.mxu0 %v1084_v32  ;;  %v1060_v39 = vadd.f32 %v2961_v21, %v806_v37 }
 0x206   : > { %v1093_v51 = vmax.f32 %v1063_v43, 0.0 }
 0x207   : > { %v1056_v40 = vadd.f32 %v1663_v36, %v2964_v23  ;;  %v1664_v41 = vpop.f32.mrb[4].mxu0  ;;  %1233 = vmatmul.mubr.f32.vlgmr.msra.gmra.mrb[20].mxu0 %v1083_v35  ;;  %v1090_v44 = vmax.f32 %v1060_v39, 0.0  ;;  %v1868_v45 = vpop.f32.mrb[4].mxu1 }
 0x208   : > { %v1665_v42 = vpop.f32.mrb[5].mxu0  ;;  %1237 = vmatprep.mubr.f32.mxu0 %v1087_v38  ;;  %v816_v48 = vpop.f32.mrb[5].mxu1  ;;  %v1069_v61 = vadd.f32 %v1868_v45, %v2961_v21 }
 0x209   : > { %v1086_v46 = vmax.f32 %v1056_v40, 0.0  ;;  %v1666_v47 = vadd.f32 %v1665_v42, %v1664_v41  ;;  %v1066_v53 = vadd.f32 %v2961_v21, %v816_v48 }
 0x20a   : > { %v1099_v5 = vmax.f32 %v1069_v61, 0.0 }
 0x20b   : > { %v1059_v49 = vadd.f32 %v1666_v47, %v2964_v23  ;;  %v1667_v50 = vpop.f32.mrb[6].mxu0  ;;  %1238 = vmatmul.mubr.f32.gmra.mrb[22].mxu0 %v1086_v46  ;;  %v1096_v62 = vmax.f32 %v1066_v53, 0.0 }
 0x20c   : > { %v1668_v52 = vpop.f32.mrb[7].mxu0  ;;  %1242 = vmatprep.mubr.f32.mxu0 %v1090_v44  ;;  %v1871_v54 = vpop.f32.mrb[6].mxu1 }
 0x20d   : > { %v1089_v55 = vmax.f32 %v1059_v49, 0.0  ;;  %v1669_v56 = vadd.f32 %v1668_v52, %v1667_v50  ;;  %v826_v57 = vpop.f32.mrb[7].mxu1  ;;  %v1075_v18 = vadd.f32 %v1871_v54, %v2961_v21 }
 0x20e   : > { %v1072_v7 = vadd.f32 %v2961_v21, %v826_v57 }
 0x20f   : > { %v1062_v58 = vadd.f32 %v1669_v56, %v2964_v23  ;;  %v1670_v59 = vpop.f32.mrb[8].mxu0  ;;  %1243 = vmatmul.mubr.f32.gmra.mrb[24].mxu0 %v1089_v55  ;;  %v1105_v28 = vmax.f32 %v1075_v18, 0.0 }
 0x210   : > { %v1671_v60 = vpop.f32.mrb[9].mxu0  ;;  %1247 = vmatprep.mubr.f32.mxu0 %v1093_v51  ;;  %v1874_v63 = vpop.f32.mrb[8].mxu1  ;;  %v1102_v12 = vmax.f32 %v1072_v7, 0.0 }
 0x211   : > { %v1092_v0 = vmax.f32 %v1062_v58, 0.0  ;;  %v1672_v1 = vadd.f32 %v1671_v60, %v1670_v59  ;;  %v836_v2 = vpop.f32.mrb[9].mxu1  ;;  %v1081_v37 = vadd.f32 %v1874_v63, %v2961_v21 }
 0x212   : > { %v1078_v29 = vadd.f32 %v2961_v21, %v836_v2 }
 0x213   : > { %v1065_v3 = vadd.f32 %v1672_v1, %v2964_v23  ;;  %v1673_v4 = vpop.f32.mrb[10].mxu0  ;;  %1248 = vmatmul.mubr.f32.gmra.mrb[26].mxu0 %v1092_v0  ;;  %v1111_v49 = vmax.f32 %v1081_v37, 0.0 }
 0x214   : > { %v1674_v6 = vpop.f32.mrb[11].mxu0  ;;  %1252 = vmatprep.mubr.f32.mxu0 %v1096_v62  ;;  %v1108_v38 = vmax.f32 %v1078_v29, 0.0 }
 0x215   : > { %v1095_v8 = vmax.f32 %v1065_v3, 0.0  ;;  %v1675_v9 = vadd.f32 %v1674_v6, %v1673_v4 }
 0x217   : > { %v1068_v10 = vadd.f32 %v1675_v9, %v2964_v23  ;;  %v1676_v11 = vpop.f32.mrb[12].mxu0  ;;  %1253 = vmatmul.mubr.f32.gmra.mrb[28].mxu0 %v1095_v8 }
 0x218   : > { %v1677_v13 = vpop.f32.mrb[13].mxu0  ;;  %1257 = vmatprep.mubr.f32.mxu0 %v1099_v5 }
 0x219   : > { %v1098_v14 = vmax.f32 %v1068_v10, 0.0  ;;  %v1678_v15 = vadd.f32 %v1677_v13, %v1676_v11 }
 0x21b   : > { %v1071_v20 = vadd.f32 %v1678_v15, %v2964_v23  ;;  %v1679_v22 = vpop.f32.mrb[14].mxu0  ;;  %1258 = vmatmul.mubr.f32.gmra.mrb[30].mxu0 %v1098_v14 }
 0x21c   : > { %v1680_v24 = vpop.f32.mrb[15].mxu0  ;;  %1262 = vmatprep.mubr.f32.mxu0 %v1102_v12 }
 0x21d   : > { %v1101_v25 = vmax.f32 %v1071_v20, 0.0  ;;  %v1681_v26 = vadd.f32 %v1680_v24, %v1679_v22 }
 0x21f   : > { %v1074_v30 = vadd.f32 %v1681_v26, %v2964_v23  ;;  %v1682_v31 = vpop.f32.mrb[16].mxu0  ;;  %1263 = vmatmul.mubr.f32.gmra.mrb[32].mxu0 %v1101_v25 }
 0x220   : > { %v1909_v17 = vpop.f32.mrb[10].mxu1  ;;  %v1683_v32 = vpop.f32.mrb[17].mxu0  ;;  %1267 = vmatprep.mubr.f32.mxu0 %v1105_v28 }
 0x221   : > { %v1104_v33 = vmax.f32 %v1074_v30, 0.0  ;;  %v1058_v34 = vadd.f32 %v1909_v17, %v1049_v27  ;;  %v1684_v35 = vadd.f32 %v1683_v32, %v1682_v31  ;;  %v947_v36 = vpop.f32.mrb[11].mxu1  ;;  %v1611_v32 = vld [vmem:[%s3111_s16] ss:$0 sm:$0xff] }
 0x222   : > { %v1055_v39 = vadd.f32 %v1049_v27, %v947_v36 }
 0x223   : > { %v1077_v19 = vadd.f32 %v1684_v35, %v2964_v23  ;;  %1268 = vmatmul.mubr.f32.gmra.mrb[34].mxu0 %v1104_v33  ;;  %v1685_v40 = vpop.f32.mrb[18].mxu0  ;;  %v1088_v44 = vmax.f32 %v1058_v34, 0.0 }
 0x224   : > { %v1085_v41 = vmax.f32 %v1055_v39, 0.0  ;;  %v1912_v42 = vpop.f32.mrb[12].mxu1  ;;  %1272 = vmatprep.mubr.f32.mxu0 %v1108_v38  ;;  %v1686_v43 = vpop.f32.mrb[19].mxu0 }
 0x225   : > { %v1107_v45 = vmax.f32 %v1077_v19, 0.0  ;;  %v1064_v46 = vadd.f32 %v1912_v42, %v1049_v27  ;;  %v957_v47 = vpop.f32.mrb[13].mxu1  ;;  %v1687_v48 = vadd.f32 %v1686_v43, %v1685_v40 }
 0x226   : > { %v1061_v50 = vadd.f32 %v1049_v27, %v957_v47  ;;  %1954 = vmatprep.mubr.f32.mxu1 %v1085_v41 }
 0x227   : > { %1955 = vmatmul.mubr.f32.vlgmr.msra.gmra.mrb[20].mxu1 %v1088_v44  ;;  %1273 = vmatmul.mubr.f32.gmra.mrb[36].mxu0 %v1107_v45  ;;  %v1080_v21 = vadd.f32 %v1687_v48, %v2964_v23  ;;  %v1094_v53 = vmax.f32 %v1064_v46, 0.0 }
 0x228   : > { %v1091_v51 = vmax.f32 %v1061_v50, 0.0  ;;  %v1915_v52 = vpop.f32.mrb[14].mxu1  ;;  %1277 = vmatprep.mubr.f32.mxu0 %v1111_v49 }
 0x229   : > { %v1070_v54 = vadd.f32 %v1915_v52, %v1049_v27  ;;  %v967_v55 = vpop.f32.mrb[15].mxu1  ;;  %v1110_v56 = vmax.f32 %v1080_v21, 0.0 }
 0x22a   : > { %v1067_v57 = vadd.f32 %v1049_v27, %v967_v55  ;;  %1957 = vmatprep.mubr.f32.mxu1 %v1091_v51 }
 0x22b   : > { %1958 = vmatmul.mubr.f32.gmra.mrb[22].mxu1 %v1094_v53  ;;  %1278 = vmatmul.mubr.f32.gmra.mrb[38].mxu0 %v1110_v56  ;;  %v1100_v60 = vmax.f32 %v1070_v54, 0.0 }
 0x22c   : > { %v1097_v58 = vmax.f32 %v1067_v57, 0.0  ;;  %v1918_v59 = vpop.f32.mrb[16].mxu1 }
 0x22d   : > { %v1076_v61 = vadd.f32 %v1918_v59, %v1049_v27  ;;  %v977_v62 = vpop.f32.mrb[17].mxu1 }
 0x22e   : > { %v1073_v63 = vadd.f32 %v1049_v27, %v977_v62  ;;  %1960 = vmatprep.mubr.f32.mxu1 %v1097_v58 }
 0x22f   : > { %1961 = vmatmul.mubr.f32.gmra.mrb[24].mxu1 %v1100_v60  ;;  %v1106_v1 = vmax.f32 %v1076_v61, 0.0 }
 0x230   : > { %v1103_v23 = vmax.f32 %v1073_v63, 0.0  ;;  %v1921_v0 = vpop.f32.mrb[18].mxu1 }
 0x231   : > { %v1082_v2 = vadd.f32 %v1921_v0, %v1049_v27  ;;  %v987_v3 = vpop.f32.mrb[19].mxu1 }
 0x232   : > { %v1079_v4 = vadd.f32 %v1049_v27, %v987_v3  ;;  %1963 = vmatprep.mubr.f32.mxu1 %v1103_v23 }
 0x233   : > { %1964 = vmatmul.mubr.f32.gmra.mrb[26].mxu1 %v1106_v1  ;;  %v1112_v6 = vmax.f32 %v1082_v2, 0.0 }
 0x234   : > { %v1109_v5 = vmax.f32 %v1079_v4, 0.0 }
 0x236   : > { %1966 = vmatprep.mubr.f32.mxu1 %v1109_v5 }
 0x237   : > { %1967 = vmatmul.mubr.f32.gmra.mrb[28].mxu1 %v1112_v6 }
 0x2da   : > { %v1772_v7 = vpop.f32.mrb[20].mxu0 }
 0x2db   : > { %v1773_v8 = vpop.f32.mrb[21].mxu0 }
 0x2dc   : > { %v1774_v9 = vadd.f32 %v1773_v8, %v1772_v7 }
 0x2de   : > { %v1775_v10 = vpop.f32.mrb[22].mxu0  ;;  %v1235_v37 = vadd.f32 %v1774_v9, %v1611_v32 }
 0x2df   : > { %v1776_v11 = vpop.f32.mrb[23].mxu0 }
 0x2e0   : > { %v1777_v12 = vadd.f32 %v1776_v11, %v1775_v10 }
 0x2e2   : > { %v1778_v13 = vpop.f32.mrb[24].mxu0  ;;  %v1240_v35 = vadd.f32 %v1777_v12, %v1611_v32 }
 0x2e3   : > { %v1779_v14 = vpop.f32.mrb[25].mxu0 }
 0x2e4   : > { %v1780_v15 = vadd.f32 %v1779_v14, %v1778_v13 }
 0x2e6   : > { %v1781_v16 = vpop.f32.mrb[26].mxu0  ;;  %v1245_v45 = vadd.f32 %v1780_v15, %v1611_v32 }
 0x2e7   : > { %v1782_v18 = vpop.f32.mrb[27].mxu0 }
 0x2e8   : > { %v1783_v20 = vadd.f32 %v1782_v18, %v1781_v16 }
 0x2ea   : > { %v1784_v22 = vpop.f32.mrb[28].mxu0  ;;  %v1250_v43 = vadd.f32 %v1783_v20, %v1611_v32 }
 0x2eb   : > { %v1785_v24 = vpop.f32.mrb[29].mxu0 }
 0x2ec   : > { %v1786_v25 = vadd.f32 %v1785_v24, %v1784_v22 }
 0x2ee   : > { %v1787_v26 = vpop.f32.mrb[30].mxu0  ;;  %v1255_v53 = vadd.f32 %v1786_v25, %v1611_v32 }
 0x2ef   : > { %v1788_v27 = vpop.f32.mrb[31].mxu0 }
 0x2f0   : > { %v1789_v28 = vadd.f32 %v1788_v27, %v1787_v26 }
 0x2f2   : > { %v1790_v29 = vpop.f32.mrb[32].mxu0  ;;  %v1260_v51 = vadd.f32 %v1789_v28, %v1611_v32 }
 0x2f3   : > { %v1791_v30 = vpop.f32.mrb[33].mxu0 }
 0x2f4   : > { %v1792_v31 = vadd.f32 %v1791_v30, %v1790_v29 }
 0x2f6   : > { %v1793_v17 = vpop.f32.mrb[34].mxu0  ;;  %v1265_v59 = vadd.f32 %v1792_v31, %v1611_v32 }
 0x2f7   : > { %v1794_v33 = vpop.f32.mrb[35].mxu0 }
 0x2f8   : > { %v1795_v34 = vadd.f32 %v1794_v33, %v1793_v17 }
 0x2fa   : > { %v1956_v36 = vpop.f32.mrb[20].mxu1  ;;  %v1796_v38 = vpop.f32.mrb[36].mxu0  ;;  %v1270_v57 = vadd.f32 %v1795_v34, %v1611_v32 }
 0x2fb   : > { %v1355_v39 = vadd.f32 %v1956_v36, %v1240_v35  ;;  %v1349_v19 = vpop.f32.mrb[21].mxu1  ;;  %v1797_v40 = vpop.f32.mrb[37].mxu0 }
 0x2fc   : > { %v1350_v41 = vadd.f32 %v1349_v19, %v1235_v37  ;;  %v1798_v42 = vadd.f32 %v1797_v40, %v1796_v38 }
 0x2fd   : > { %1399 = vst [vmem:[%s2992_s21 + $0x8] sm:$0xff] %v1355_v39 }
 0x2fe   : > { %1398 = vst [vmem:[%s2992_s21] sm:$0xff] %v1350_v41  ;;  %v1959_v44 = vpop.f32.mrb[22].mxu1  ;;  %v1799_v46 = vpop.f32.mrb[38].mxu0  ;;  %v1275_v0 = vadd.f32 %v1798_v42, %v1611_v32 }
 0x2ff   : > { %v1365_v47 = vadd.f32 %v1959_v44, %v1250_v43  ;;  %v1359_v48 = vpop.f32.mrb[23].mxu1  ;;  %v1800_v49 = vpop.f32.mrb[39].mxu0 }
 0x300   : > { %v1360_v50 = vadd.f32 %v1359_v48, %v1245_v45  ;;  %v1801_v21 = vadd.f32 %v1800_v49, %v1799_v46 }
 0x301   : > { %1401 = vst [vmem:[%s2992_s21 + $0x18] sm:$0xff] %v1365_v47 }
 0x302   : > { %1400 = vst [vmem:[%s2992_s21 + $0x10] sm:$0xff] %v1360_v50  ;;  %v1962_v52 = vpop.f32.mrb[24].mxu1  ;;  %v1280_v62 = vadd.f32 %v1801_v21, %v1611_v32 }
 0x303   : > { %v1375_v54 = vadd.f32 %v1962_v52, %v1260_v51  ;;  %v1369_v55 = vpop.f32.mrb[25].mxu1 }
 0x304   : > { %v1370_v56 = vadd.f32 %v1369_v55, %v1255_v53 }
 0x305   : > { %1403 = vst [vmem:[%s2992_s21 + $0x28] sm:$0xff] %v1375_v54 }
 0x306   : > { %1402 = vst [vmem:[%s2992_s21 + $0x20] sm:$0xff] %v1370_v56  ;;  %v1965_v58 = vpop.f32.mrb[26].mxu1 }
 0x307   : > { %v1385_v60 = vadd.f32 %v1965_v58, %v1270_v57  ;;  %v1379_v61 = vpop.f32.mrb[27].mxu1 }
 0x308   : > { %v1380_v63 = vadd.f32 %v1379_v61, %v1265_v59  ;;  %1415 = sbr.rel (!%p3113_p3) target bundleno = 812 (0x32c), region = 88 }
 0x309   : > { %1405 = vst [vmem:[%s2992_s21 + $0x38] sm:$0xff] %v1385_v60 }
 0x30a   : > { %1404 = vst [vmem:[%s2992_s21 + $0x30] sm:$0xff] %v1380_v63  ;;  %v1968_v23 = vpop.f32.mrb[28].mxu1 }
 0x30b   : > { %v1395_v1 = vadd.f32 %v1968_v23, %v1280_v62  ;;  %v1389_v2 = vpop.f32.mrb[29].mxu1 }
 0x30c   : > { %v1390_v3 = vadd.f32 %v1389_v2, %v1275_v0 }
 0x30d   : > { %1407 = vst [vmem:[%s2992_s21 + $0x48] sm:$0xff] %v1395_v1 }
 0x30e   : > { %1406 = vst [vmem:[%s2992_s21 + $0x40] sm:$0xff] %v1390_v3 }
 0x30f   : > { %s3130_s24 = smov (!%p1418_p10, %s1417_s24), 10 }
 0x310   : > { %s3008_s19 = sshll.u32 %s3130_s24, 7 }
 0x311   : > { %s1422_s18 = ssub.s32 1280, %s3008_s19 }
 0x312   : > { %1423 = vsyncadd %s1409_s17, %s1422_s18  ;;  %p1613_p5 = scmp.ne.s32.totalorder %s3008_s19, 0  ;;  %s1624_s3 = smul.u32 1280, %s2591_s13 }
 0x313   : > { %s1428_s30 = sshll.u32 %s2992_s21, 4  ;;  %s3114_s22 = sld [smem:[#allocation28_spill]]  ;;  %s3021_s30 = int_to_ptr.vmem [resolvable:$true] %s1428_s30 }
 0x314   : > { %s2422_s28 = scalar_lea.vmem %s3021_s30, %s3008_s19  ;;  %s2517_s20 = smov [#allocation15]  }
 0x315   : > { %p2423_p6 = scmp.ne.s32.totalorder %s3021_s30, %s2422_s28  ;;  %s2426_s14 = sshll.u32 %s2517_s20, 4  ;;  %s2427_s14 = int_to_ptr.vmem [resolvable:$false] %s2426_s14 }
 0x316   : > { %s2428_s13 = scalar_lea.vmem %s2427_s14, 2560  ;;  %p2429_p12 = scmp.lt.s32.totalorder %s3021_s30, %s2427_s14 }
 0x317   : > { %p2424_p11 = pnand %p2423_p6, %p1613_p5  ;;  %p2430_p13 = scmp.lt.s32.totalorder %s2428_s13, %s2422_s28 }
 0x319   : > { %s3019_s26 = scalar_lea.hbm %s3114_s22, %s1624_s3  ;;  %p2425_p0 = pneg %p2424_p11 }
 0x31a   : > { %p2431_p7 = por %p2430_p13, %p2429_p12 }
 0x31c   : > { %p2432_p2 = pnand %p2431_p7, %p2425_p0 }
 0x31e   : > { %2435 = shalt.err (!%p2432_p2)
}
 0x31f   : > { %s2436_s29 = scalar_lea.hbm %s3019_s26, %s3008_s19  ;;  %s2440_s21 = scalar_lea.hbm %s3114_s22, 2432 }
 0x320   : > { %p2437_p8 = scmp.ne.s32.totalorder %s3019_s26, %s2436_s29  ;;  %p2441_p3 = scmp.lt.u32.totalorder %s3019_s26, %s3114_s22 }
 0x321   : > { %p2442_p10 = scmp.lt.u32.totalorder %s2440_s21, %s2436_s29  ;;  %p2444_p11 = scmp.lt.u32.totalorder %s2436_s29, %s3019_s26 }
 0x322   : > { %p2438_p9 = pnand %p2437_p8, %p1613_p5 }
 0x323   : > { %p2443_p6 = por %p2442_p10, %p2441_p3 }
 0x324   : > { %p2439_p1 = pneg %p2438_p9 }
 0x325   : > { %p2445_p0 = por %p2444_p11, %p2443_p6 }
 0x327   : > { %p2446_p12 = pnand %p2445_p0, %p2439_p1 }
 0x329   : > { %2449 = shalt.err (!%p2446_p12)
}
 0x32a   : > { %s2518_s24 = smov 128   ;;  %s2519_s18 = smov 8  }
 0x32b   : > { %1434 = dma.vmem_to_hbm [thread:$0]  (%p1613_p5), %s3021_s30, %s3008_s19, %s3019_s26, %s1409_s17, %s2518_s24, %s2518_s24, %s2519_s18  }
 0x32c PF: > { %s3115_s3 = sld [smem:[#allocation21_spill]]  ;;  %s3116_s23 = sld [smem:[#allocation25_spill]] }
 0x332   : > { %s1443_s25 = sand.u32 1, %s3115_s3   ;;  %p3117_p13 = scmp.ne.s32.totalorder %s3116_s23, 0 }
 0x333   : > { %s1444_s28 = scalar_lea.sflag [#allocation5], %s1443_s25 }
 0x334   : > { %p2168_p7 = pnand %p1588_p4, %p3117_p13 }
 0x336   : > { %2483 = dma.done.wait (!%p2168_p7), %s1444_s28, 1280  }
 0x337   : > { %2485 = vsyncadd (!%p2168_p7), %s1444_s28, 4294966016  ;;  %s3118_s12 = sld [smem:[#allocation22_spill]]  ;;  %s3119_s20 = sld [smem:[#allocation23_spill]] }
 0x338   : > { %s3120_s30 = smov %s2492_s10  ;;  %s3121_s10 = smov %s2496_s11 }
 0x33d   : > { %p27_p2 = scmp.ge.s32.totalorder %s3118_s12, 4   ;;  %s3122_s11 = smov %s3119_s20 }
 0x33f   :  { %29 = sbr.rel (!%p27_p2) target bundleno = 13 (0xd), region = 141 }
 0x346   :  { %1449 = vsyncpa [#allocation4], 1 }
 0x347   :  { %1451 = vsyncpa [#allocation4 + $0x1], 1 }
 0x348   :  { %1452 = vsyncpa [#allocation7], 1 }
 0x349   :  { %1454 = vsyncpa [#allocation7 + $0x1], 1 }
 0x34a   :  { %1455 = vsyncpa [#allocation10], 1 }
 0x34b   :  { %1456 = vsyncpa [#allocation13], 1 }
 0x34c   :  { %1457 = vsyncpa [#allocation5], 1 }
 0x34d   :  { %1459 = vsyncpa [#allocation5 + $0x1], 1 }

</bundles_post_ra>
